<compile_context>
chip_gen: v6e
topology: v6e:2x2x1
jax: 0.10.0
libtpu: 0.0.40
codegen_flags: <defaults>
</compile_context>

<pallas_src>
import math

import jax
import jax.numpy as jnp
import numpy as np
from jax.experimental import pallas as pl
from jax.experimental.pallas import tpu as pltpu

A_DIM = 6
A_PAD = 128                          # lane-dense logits/probs block; cols 6..127 -> prob 0
S_DIM = (6, 8)
HID = 128
CONV_K = 4
PACK_IN = S_DIM[0] * S_DIM[1]        # 48 flattened state features
PACK_OUT = 1920                      # rectified branch cols: 128+128+640+640+384 (branch 5 folded)
N_CHUNK = 5
CHUNK = PACK_OUT // N_CHUNK          # 384, a multiple of 128 lanes
MAX_TM = 512                         # upper bound on batch tile (rows)


def _round_up(n, m):
    return ((n + m - 1) // m) * m


# ----------------------------------------------------------------------------
# Pallas kernel: fused (packed branches -> Linear(1920,128)) -> ReLU
#                -> Linear(128,128-padded) -> softmax
# ----------------------------------------------------------------------------
def _actor_kernel(x_ref, wp_ref, bp_ref, w5f_ref, w3_ref, b3_ref, w4_ref, b4_ref,
                  o_ref, acc_ref):
    f32 = jnp.float32
    x = x_ref[...]                                                       # [TM, 48] f32

    # Stage-2 accumulator init: un-rectified branch-5 fold (through W3) + fused bias.
    acc_ref[...] = jnp.dot(x, w5f_ref[...], preferred_element_type=f32) + b3_ref[...]

    # Fused stage 1 -> stage 2 over 384-column chunks of the rectified branches:
    #   acc += relu(x @ Wp[:, c] + bp[:, c]) @ W3[c, :]
    def chunk_body(c, carry):
        off = pl.multiple_of(c * CHUNK, 128)
        pre = jnp.dot(x, wp_ref[:, pl.ds(off, CHUNK)],
                      preferred_element_type=f32) + bp_ref[:, pl.ds(off, CHUNK)]
        h_c = jnp.maximum(pre, 0.0).astype(jnp.bfloat16)
        acc_ref[...] += jnp.dot(h_c, w3_ref[pl.ds(off, CHUNK), :],
                                preferred_element_type=f32)
        return carry

    jax.lax.fori_loop(0, N_CHUNK, chunk_body, 0, unroll=True)

    # Stage 3: ReLU -> Linear(128, 128-padded) -> softmax (padded cols have bias -1e30).
    h2 = jnp.maximum(acc_ref[...], 0.0)
    logits = jnp.dot(h2, w4_ref[...], preferred_element_type=f32) + b4_ref[...]
    m = jnp.max(logits, axis=1, keepdims=True)
    e = jnp.exp(logits - m)
    denom = jnp.sum(e, axis=1, keepdims=True)
    o_ref[...] = e * pl.reciprocal(denom, approx=False)    # exact: rows sum to 1


# ----------------------------------------------------------------------------
# Wrapper
# ----------------------------------------------------------------------------
def actor_forward(x, packed):
    """x: [B, 6, 8] (or anything reshapeable to [B, 48]). Returns [B, A_DIM] probs."""
    wp, bp, w5f, w3, b3, w4, b4 = packed
    x48 = x.astype(jnp.float32).reshape(-1, PACK_IN)
    B = x48.shape[0]

    if B <= 128:
        tm = _round_up(max(B, 1), 8)                       # single tile for small batches
    else:
        tm = min(MAX_TM, _round_up((B + 1) // 2, 8))       # >=2 tiles -> both v7x TCs
    b_pad = _round_up(B, tm)
    if b_pad != B:
        x48 = jnp.pad(x48, ((0, b_pad - B), (0, 0)))
    grid = (b_pad // tm,)

    const = lambda i: (0, 0)                               # weights stay resident across tiles
    out = pl.pallas_call(
        _actor_kernel,
        out_shape=jax.ShapeDtypeStruct((b_pad, A_PAD), jnp.float32),
        grid_spec=pltpu.PrefetchScalarGridSpec(
            num_scalar_prefetch=0,
            grid=grid,
            in_specs=[
                pl.BlockSpec((tm, PACK_IN), lambda i: (i, 0)),     # x48 tile         f32
                pl.BlockSpec((PACK_IN, PACK_OUT), const),          # W_pack [48,1920] f32
                pl.BlockSpec((1, PACK_OUT), const),                # b_pack [1,1920]  f32
                pl.BlockSpec((PACK_IN, HID), const),               # W5fold [48,128]  f32
                pl.BlockSpec((PACK_OUT, HID), const),              # W3     [1920,128] bf16
                pl.BlockSpec((1, HID), const),                     # b3     [1,128]   f32
                pl.BlockSpec((HID, A_PAD), const),                 # W4     [128,128] f32
                pl.BlockSpec((1, A_PAD), const),                   # b4     [1,128]   f32
            ],
            out_specs=pl.BlockSpec((tm, A_PAD), lambda i: (i, 0)),
            scratch_shapes=[pltpu.VMEM((tm, HID), jnp.float32)],   # stage-2 accumulator
        ),
        compiler_params=pltpu.CompilerParams(
            dimension_semantics=("parallel",),
            vmem_limit_bytes=32 * 1024 * 1024,
        ),
    )(x48, wp, bp, w5f, w3, b3, w4, b4)
    return out[:B, :A_DIM]


# ----------------------------------------------------------------------------
# Parameter init (torch-layout f32) and offline packing into kernel operands
# ----------------------------------------------------------------------------
def init_params(key):
    """f32 weights in torch layout, torch-default-like U[-1/sqrt(fan_in), +] init."""
    ks = jax.random.split(key, 12)

    def u(k, shape, fan_in):
        b = 1.0 / math.sqrt(fan_in)
        return jax.random.uniform(k, shape, jnp.float32, -b, b)

    return dict(
        w_conv=u(ks[0], (HID, 1, CONV_K), CONV_K), b_conv=u(ks[1], (HID,), CONV_K),
        w_l0=u(ks[2], (HID, 1), 1),                b_l0=u(ks[3], (HID,), 1),
        w_l1=u(ks[4], (HID, 1), 1),                b_l1=u(ks[5], (HID,), 1),
        w_l2=u(ks[6], (HID, 1), 1),                b_l2=u(ks[7], (HID,), 1),
        w_l3=u(ks[8], (HID, 2048), 2048),          b_l3=u(ks[9], (HID,), 2048),
        w_l4=u(ks[10], (A_DIM, HID), HID),         b_l4=u(ks[11], (A_DIM,), HID),
    )


def pack_params(raw):
    """Fold branches 0-4 into one [48, 1920] block matmul; fold un-rectified branch 5
    through linear3 into a [48, 128] rank-1 matrix + bias; pad linear4 to 128 cols."""
    wc = np.asarray(raw["w_conv"], np.float32)   # [128, 1, 4]
    bc = np.asarray(raw["b_conv"], np.float32)   # [128]
    C = HID

    def conv_as_matmul(l_in):
        # out_flat[b, c*Lo + t] = sum_k wc[c,0,k] * x[b, t+k] + bc[c]
        lo = l_in - CONV_K + 1
        M = np.zeros((l_in, C * lo), np.float32)
        for t in range(lo):
            for k in range(CONV_K):
                M[t + k, np.arange(C) * lo + t] = wc[:, 0, k]
        return M, np.repeat(bc, lo)

    M8, bM8 = conv_as_matmul(S_DIM[1])   # [8, 640], [640]
    M6, bM6 = conv_as_matmul(A_DIM)      # [6, 384], [384]

    Wp = np.zeros((PACK_IN, PACK_OUT), np.float32)
    bp = np.zeros((PACK_OUT,), np.float32)
    # branch 0: linear0 on x[:, 0, -1]   (flattened feature 7)
    Wp[7, 0:128] = np.asarray(raw["w_l0"], np.float32)[:, 0];   bp[0:128] = np.asarray(raw["b_l0"])
    # branch 1: linear1 on x[:, 1, -1]   (feature 15)
    Wp[15, 128:256] = np.asarray(raw["w_l1"], np.float32)[:, 0]; bp[128:256] = np.asarray(raw["b_l1"])
    # branch 2: conv1 on x[:, 2, :]      (features 16..23)
    Wp[16:24, 256:896] = M8;     bp[256:896] = bM8
    # branch 3: conv1 on x[:, 3, :]      (features 24..31)
    Wp[24:32, 896:1536] = M8;    bp[896:1536] = bM8
    # branch 4: conv1 on x[:, 4, :A_DIM] (features 32..37)
    Wp[32:38, 1536:1920] = M6;   bp[1536:1920] = bM6

    W3_full = np.asarray(raw["w_l3"], np.float32).T      # [2048, 128]
    W3 = W3_full[:PACK_OUT, :]                           # [1920, 128] (rectified branches)
    W3_b5 = W3_full[PACK_OUT:, :]                        # [128, 128]  (branch-5 block)

    # branch 5 (no ReLU): s5 @ W3_b5 = x47 * (w_l2 @ W3_b5) + b_l2 @ W3_b5
    W5fold = np.zeros((PACK_IN, HID), np.float32)
    W5fold[47, :] = np.asarray(raw["w_l2"], np.float32)[:, 0] @ W3_b5
    b3 = np.asarray(raw["b_l3"], np.float32) + np.asarray(raw["b_l2"], np.float32) @ W3_b5

    # linear4 padded to 128 lane-dense columns; padded biases -> -1e30 so exp == 0.
    W4 = np.zeros((HID, A_PAD), np.float32)
    W4[:, :A_DIM] = np.asarray(raw["w_l4"], np.float32).T
    b4 = np.full((A_PAD,), -1e30, np.float32)
    b4[:A_DIM] = np.asarray(raw["b_l4"], np.float32)

    return (
        jnp.asarray(Wp, jnp.float32),           # stage 1 stays f32 (dynamic-range safety)
        jnp.asarray(bp[None, :], jnp.float32),
        jnp.asarray(W5fold, jnp.float32),
        jnp.asarray(W3, jnp.bfloat16),          # FLOP-dominant operand -> bf16 MXU
        jnp.asarray(b3[None, :], jnp.float32),
        jnp.asarray(W4, jnp.float32),
        jnp.asarray(b4[None, :], jnp.float32),
    )


# ----------------------------------------------------------------------------
# Pure-JAX f32 reference mirroring the PyTorch forward (for correctness check)
# ----------------------------------------------------------------------------
def reference_forward(x, raw):
    B = x.shape[0]
    xf = x.astype(jnp.float32).reshape(B, S_DIM[0], S_DIM[1])

    def lin(v, w, b):                  # torch layout: w [out, in], b [out]
        return v @ w.T + b

    def conv(v):                       # v: [B, L] -> flattened [B, 128*(L-3)]
        lo = v.shape[1] - CONV_K + 1
        win = jnp.stack([v[:, t:t + CONV_K] for t in range(lo)], axis=1)   # [B, Lo, K]
        out = jnp.einsum("blk,ck->bcl", win, raw["w_conv"][:, 0, :])
        out = out + raw["b_conv"][None, :, None]
        return out.reshape(B, -1)

    s0 = jax.nn.relu(lin(xf[:, 0, -1:], raw["w_l0"], raw["b_l0"]))
    s1 = jax.nn.relu(lin(xf[:, 1, -1:], raw["w_l1"], raw["b_l1"]))
    s2 = jax.nn.relu(conv(xf[:, 2, :]))
    s3 = jax.nn.relu(conv(xf[:, 3, :]))
    s4 = jax.nn.relu(conv(xf[:, 4, :A_DIM]))
    s5 = lin(xf[:, 5, -1:], raw["w_l2"], raw["b_l2"])      # no ReLU
    h = jnp.concatenate([s0, s1, s2, s3, s4, s5], axis=1)  # [B, 2048]
    h = jax.nn.relu(lin(h, raw["w_l3"], raw["b_l3"]))
    logits = lin(h, raw["w_l4"], raw["b_l4"])
    return jax.nn.softmax(logits, axis=1)


if __name__ == "__main__":
    key = jax.random.PRNGKey(0)
    kx, kp = jax.random.split(key)

    B = 4
    x = jax.random.normal(kx, (B, S_DIM[0], S_DIM[1]), dtype=jnp.float32)
    raw = init_params(kp)
    packed = pack_params(raw)

    out = jax.jit(actor_forward)(x, packed)
    out = jax.block_until_ready(out)

    assert out.shape == (B, A_DIM), out.shape
    assert bool(jnp.all(jnp.isfinite(out)))
    # exact reciprocal + padded-prob-0 columns => rows sum to 1 to f32 precision
    assert bool(jnp.all(jnp.abs(jnp.sum(out, axis=1) - 1.0) < 1e-3))
    # match f32 branch-by-branch reference (bf16 only on the stage-2 matmul)
    ref = reference_forward(x, raw)
    assert bool(jnp.max(jnp.abs(out - ref)) < 3e-2)

    print("KERNEL_OK")
</pallas_src>

<mosaic_0001>
module attributes {stable_mosaic.version = 11 : i64} {
  func.func @_actor_kernel(%arg0: i32, %arg1: memref<8x48xf32, #tpu.memory_space<vmem>>, %arg2: memref<48x1920xf32, #tpu.memory_space<vmem>>, %arg3: memref<1x1920xf32, #tpu.memory_space<vmem>>, %arg4: memref<48x128xf32, #tpu.memory_space<vmem>>, %arg5: memref<1920x128xbf16, #tpu.memory_space<vmem>>, %arg6: memref<1x128xf32, #tpu.memory_space<vmem>>, %arg7: memref<128x128xf32, #tpu.memory_space<vmem>>, %arg8: memref<1x128xf32, #tpu.memory_space<vmem>>, %arg9: memref<8x128xf32, #tpu.memory_space<vmem>>, %arg10: memref<8x128xf32, #tpu.memory_space<vmem>>) attributes {dimension_semantics = [#tpu.dimension_semantics<parallel>], iteration_bounds = array<i64: 1>, scalar_prefetch = 0 : i64, scratch_operands = 1 : i64, tpu.core_type = #tpu.core_type<tc>, window_params = [{transform_indices = @transform_0, window_bounds = array<i64: 8, 48>}, {pipeline_mode = #tpu.pipeline_mode<synchronous>, transform_indices = @transform_1, window_bounds = array<i64: 48, 1920>}, {pipeline_mode = #tpu.pipeline_mode<synchronous>, transform_indices = @transform_2, window_bounds = array<i64: 1, 1920>}, {pipeline_mode = #tpu.pipeline_mode<synchronous>, transform_indices = @transform_3, window_bounds = array<i64: 48, 128>}, {pipeline_mode = #tpu.pipeline_mode<synchronous>, transform_indices = @transform_4, window_bounds = array<i64: 1920, 128>}, {pipeline_mode = #tpu.pipeline_mode<synchronous>, transform_indices = @transform_5, window_bounds = array<i64: 1, 128>}, {pipeline_mode = #tpu.pipeline_mode<synchronous>, transform_indices = @transform_6, window_bounds = array<i64: 128, 128>}, {pipeline_mode = #tpu.pipeline_mode<synchronous>, transform_indices = @transform_7, window_bounds = array<i64: 1, 128>}, {transform_indices = @transform_8, window_bounds = array<i64: 8, 128>}]} {
    %c0 = arith.constant 0 : index
    %c0_0 = arith.constant 0 : index
    %0 = vector.load %arg1[%c0, %c0_0] : memref<8x48xf32, #tpu.memory_space<vmem>>, vector<8x48xf32>
    %c0_1 = arith.constant 0 : index
    %c0_2 = arith.constant 0 : index
    %1 = vector.load %arg4[%c0_1, %c0_2] : memref<48x128xf32, #tpu.memory_space<vmem>>, vector<48x128xf32>
    %cst = arith.constant dense<0.000000e+00> : vector<8x128xf32>
    %2 = tpu.matmul %0, %1, %cst {dimension_numbers = #tpu.dot_dimension_numbers<[1], [0], [0], [1], [0, 0, 1, 1], [], []>} : vector<8x48xf32>, vector<48x128xf32>, vector<8x128xf32> -> vector<8x128xf32>
    %c0_3 = arith.constant 0 : index
    %c0_4 = arith.constant 0 : index
    %3 = vector.load %arg6[%c0_3, %c0_4] : memref<1x128xf32, #tpu.memory_space<vmem>>, vector<1x128xf32>
    %4 = vector.broadcast %3 : vector<1x128xf32> to vector<8x128xf32>
    %5 = arith.addf %2, %4 : vector<8x128xf32>
    %c0_5 = arith.constant 0 : index
    %c0_6 = arith.constant 0 : index
    %6 = vector.load %arg10[%c0_5, %c0_6] : memref<8x128xf32, #tpu.memory_space<vmem>>, vector<8x128xf32>
    tpu.vector_store %arg10[%c0_5, %c0_6], %5 {strides = array<i32>} : memref<8x128xf32, #tpu.memory_space<vmem>>, vector<8x128xf32>,
    %c0_i32 = arith.constant 0 : i32
    %c384_i32 = arith.constant 384 : i32
    %7 = arith.muli %c0_i32, %c384_i32 : i32
    %8 = tpu.assume_multiple %7, 128 : i32
    %c0_7 = arith.constant 0 : index
    %9 = arith.index_cast %8 : i32 to index
    %10 = vector.load %arg2[%c0_7, %9] : memref<48x1920xf32, #tpu.memory_space<vmem>>, vector<48x384xf32>
    %cst_8 = arith.constant dense<0.000000e+00> : vector<8x384xf32>
    %11 = tpu.matmul %0, %10, %cst_8 {dimension_numbers = #tpu.dot_dimension_numbers<[1], [0], [0], [1], [0, 0, 1, 1], [], []>} : vector<8x48xf32>, vector<48x384xf32>, vector<8x384xf32> -> vector<8x384xf32>
    %c0_9 = arith.constant 0 : index
    %12 = arith.index_cast %8 : i32 to index
    %13 = vector.load %arg3[%c0_9, %12] : memref<1x1920xf32, #tpu.memory_space<vmem>>, vector<1x384xf32>
    %14 = vector.broadcast %13 : vector<1x384xf32> to vector<8x384xf32>
    %15 = arith.addf %11, %14 : vector<8x384xf32>
    %cst_10 = arith.constant 0.000000e+00 : f32
    %16 = vector.broadcast %cst_10 : f32 to vector<8x384xf32>
    %17 = arith.maximumf %15, %16 : vector<8x384xf32>
    %18 = arith.truncf %17 : vector<8x384xf32> to vector<8x384xbf16>
    %c0_11 = arith.constant 0 : index
    %c0_12 = arith.constant 0 : index
    %19 = vector.load %arg10[%c0_11, %c0_12] : memref<8x128xf32, #tpu.memory_space<vmem>>, vector<8x128xf32>
    %20 = arith.index_cast %8 : i32 to index
    %c0_13 = arith.constant 0 : index
    %21 = vector.load %arg5[%20, %c0_13] : memref<1920x128xbf16, #tpu.memory_space<vmem>>, vector<384x128xbf16>
    %cst_14 = arith.constant dense<0.000000e+00> : vector<8x128xf32>
    %22 = tpu.matmul %18, %21, %cst_14 {dimension_numbers = #tpu.dot_dimension_numbers<[1], [0], [0], [1], [0, 0, 1, 1], [], []>} : vector<8x384xbf16>, vector<384x128xbf16>, vector<8x128xf32> -> vector<8x128xf32>
    %23 = arith.addf %19, %22 : vector<8x128xf32>
    %c0_15 = arith.constant 0 : index
    %c0_16 = arith.constant 0 : index
    %24 = vector.load %arg10[%c0_15, %c0_16] : memref<8x128xf32, #tpu.memory_space<vmem>>, vector<8x128xf32>
    tpu.vector_store %arg10[%c0_15, %c0_16], %23 {strides = array<i32>} : memref<8x128xf32, #tpu.memory_space<vmem>>, vector<8x128xf32>,
    %c1_i32 = arith.constant 1 : i32
    %c384_i32_17 = arith.constant 384 : i32
    %25 = arith.muli %c1_i32, %c384_i32_17 : i32
    %26 = tpu.assume_multiple %25, 128 : i32
    %c0_18 = arith.constant 0 : index
    %27 = arith.index_cast %26 : i32 to index
    %28 = vector.load %arg2[%c0_18, %27] : memref<48x1920xf32, #tpu.memory_space<vmem>>, vector<48x384xf32>
    %cst_19 = arith.constant dense<0.000000e+00> : vector<8x384xf32>
    %29 = tpu.matmul %0, %28, %cst_19 {dimension_numbers = #tpu.dot_dimension_numbers<[1], [0], [0], [1], [0, 0, 1, 1], [], []>} : vector<8x48xf32>, vector<48x384xf32>, vector<8x384xf32> -> vector<8x384xf32>
    %c0_20 = arith.constant 0 : index
    %30 = arith.index_cast %26 : i32 to index
    %31 = vector.load %arg3[%c0_20, %30] : memref<1x1920xf32, #tpu.memory_space<vmem>>, vector<1x384xf32>
    %32 = vector.broadcast %31 : vector<1x384xf32> to vector<8x384xf32>
    %33 = arith.addf %29, %32 : vector<8x384xf32>
    %cst_21 = arith.constant 0.000000e+00 : f32
    %34 = vector.broadcast %cst_21 : f32 to vector<8x384xf32>
    %35 = arith.maximumf %33, %34 : vector<8x384xf32>
    %36 = arith.truncf %35 : vector<8x384xf32> to vector<8x384xbf16>
    %c0_22 = arith.constant 0 : index
    %c0_23 = arith.constant 0 : index
    %37 = vector.load %arg10[%c0_22, %c0_23] : memref<8x128xf32, #tpu.memory_space<vmem>>, vector<8x128xf32>
    %38 = arith.index_cast %26 : i32 to index
    %c0_24 = arith.constant 0 : index
    %39 = vector.load %arg5[%38, %c0_24] : memref<1920x128xbf16, #tpu.memory_space<vmem>>, vector<384x128xbf16>
    %cst_25 = arith.constant dense<0.000000e+00> : vector<8x128xf32>
    %40 = tpu.matmul %36, %39, %cst_25 {dimension_numbers = #tpu.dot_dimension_numbers<[1], [0], [0], [1], [0, 0, 1, 1], [], []>} : vector<8x384xbf16>, vector<384x128xbf16>, vector<8x128xf32> -> vector<8x128xf32>
    %41 = arith.addf %37, %40 : vector<8x128xf32>
    %c0_26 = arith.constant 0 : index
    %c0_27 = arith.constant 0 : index
    %42 = vector.load %arg10[%c0_26, %c0_27] : memref<8x128xf32, #tpu.memory_space<vmem>>, vector<8x128xf32>
    tpu.vector_store %arg10[%c0_26, %c0_27], %41 {strides = array<i32>} : memref<8x128xf32, #tpu.memory_space<vmem>>, vector<8x128xf32>,
    %c2_i32 = arith.constant 2 : i32
    %c384_i32_28 = arith.constant 384 : i32
    %43 = arith.muli %c2_i32, %c384_i32_28 : i32
    %44 = tpu.assume_multiple %43, 128 : i32
    %c0_29 = arith.constant 0 : index
    %45 = arith.index_cast %44 : i32 to index
    %46 = vector.load %arg2[%c0_29, %45] : memref<48x1920xf32, #tpu.memory_space<vmem>>, vector<48x384xf32>
    %cst_30 = arith.constant dense<0.000000e+00> : vector<8x384xf32>
    %47 = tpu.matmul %0, %46, %cst_30 {dimension_numbers = #tpu.dot_dimension_numbers<[1], [0], [0], [1], [0, 0, 1, 1], [], []>} : vector<8x48xf32>, vector<48x384xf32>, vector<8x384xf32> -> vector<8x384xf32>
    %c0_31 = arith.constant 0 : index
    %48 = arith.index_cast %44 : i32 to index
    %49 = vector.load %arg3[%c0_31, %48] : memref<1x1920xf32, #tpu.memory_space<vmem>>, vector<1x384xf32>
    %50 = vector.broadcast %49 : vector<1x384xf32> to vector<8x384xf32>
    %51 = arith.addf %47, %50 : vector<8x384xf32>
    %cst_32 = arith.constant 0.000000e+00 : f32
    %52 = vector.broadcast %cst_32 : f32 to vector<8x384xf32>
    %53 = arith.maximumf %51, %52 : vector<8x384xf32>
    %54 = arith.truncf %53 : vector<8x384xf32> to vector<8x384xbf16>
    %c0_33 = arith.constant 0 : index
    %c0_34 = arith.constant 0 : index
    %55 = vector.load %arg10[%c0_33, %c0_34] : memref<8x128xf32, #tpu.memory_space<vmem>>, vector<8x128xf32>
    %56 = arith.index_cast %44 : i32 to index
    %c0_35 = arith.constant 0 : index
    %57 = vector.load %arg5[%56, %c0_35] : memref<1920x128xbf16, #tpu.memory_space<vmem>>, vector<384x128xbf16>
    %cst_36 = arith.constant dense<0.000000e+00> : vector<8x128xf32>
    %58 = tpu.matmul %54, %57, %cst_36 {dimension_numbers = #tpu.dot_dimension_numbers<[1], [0], [0], [1], [0, 0, 1, 1], [], []>} : vector<8x384xbf16>, vector<384x128xbf16>, vector<8x128xf32> -> vector<8x128xf32>
    %59 = arith.addf %55, %58 : vector<8x128xf32>
    %c0_37 = arith.constant 0 : index
    %c0_38 = arith.constant 0 : index
    %60 = vector.load %arg10[%c0_37, %c0_38] : memref<8x128xf32, #tpu.memory_space<vmem>>, vector<8x128xf32>
    tpu.vector_store %arg10[%c0_37, %c0_38], %59 {strides = array<i32>} : memref<8x128xf32, #tpu.memory_space<vmem>>, vector<8x128xf32>,
    %c3_i32 = arith.constant 3 : i32
    %c384_i32_39 = arith.constant 384 : i32
    %61 = arith.muli %c3_i32, %c384_i32_39 : i32
    %62 = tpu.assume_multiple %61, 128 : i32
    %c0_40 = arith.constant 0 : index
    %63 = arith.index_cast %62 : i32 to index
    %64 = vector.load %arg2[%c0_40, %63] : memref<48x1920xf32, #tpu.memory_space<vmem>>, vector<48x384xf32>
    %cst_41 = arith.constant dense<0.000000e+00> : vector<8x384xf32>
    %65 = tpu.matmul %0, %64, %cst_41 {dimension_numbers = #tpu.dot_dimension_numbers<[1], [0], [0], [1], [0, 0, 1, 1], [], []>} : vector<8x48xf32>, vector<48x384xf32>, vector<8x384xf32> -> vector<8x384xf32>
    %c0_42 = arith.constant 0 : index
    %66 = arith.index_cast %62 : i32 to index
    %67 = vector.load %arg3[%c0_42, %66] : memref<1x1920xf32, #tpu.memory_space<vmem>>, vector<1x384xf32>
    %68 = vector.broadcast %67 : vector<1x384xf32> to vector<8x384xf32>
    %69 = arith.addf %65, %68 : vector<8x384xf32>
    %cst_43 = arith.constant 0.000000e+00 : f32
    %70 = vector.broadcast %cst_43 : f32 to vector<8x384xf32>
    %71 = arith.maximumf %69, %70 : vector<8x384xf32>
    %72 = arith.truncf %71 : vector<8x384xf32> to vector<8x384xbf16>
    %c0_44 = arith.constant 0 : index
    %c0_45 = arith.constant 0 : index
    %73 = vector.load %arg10[%c0_44, %c0_45] : memref<8x128xf32, #tpu.memory_space<vmem>>, vector<8x128xf32>
    %74 = arith.index_cast %62 : i32 to index
    %c0_46 = arith.constant 0 : index
    %75 = vector.load %arg5[%74, %c0_46] : memref<1920x128xbf16, #tpu.memory_space<vmem>>, vector<384x128xbf16>
    %cst_47 = arith.constant dense<0.000000e+00> : vector<8x128xf32>
    %76 = tpu.matmul %72, %75, %cst_47 {dimension_numbers = #tpu.dot_dimension_numbers<[1], [0], [0], [1], [0, 0, 1, 1], [], []>} : vector<8x384xbf16>, vector<384x128xbf16>, vector<8x128xf32> -> vector<8x128xf32>
    %77 = arith.addf %73, %76 : vector<8x128xf32>
    %c0_48 = arith.constant 0 : index
    %c0_49 = arith.constant 0 : index
    %78 = vector.load %arg10[%c0_48, %c0_49] : memref<8x128xf32, #tpu.memory_space<vmem>>, vector<8x128xf32>
    tpu.vector_store %arg10[%c0_48, %c0_49], %77 {strides = array<i32>} : memref<8x128xf32, #tpu.memory_space<vmem>>, vector<8x128xf32>,
    %c4_i32 = arith.constant 4 : i32
    %c384_i32_50 = arith.constant 384 : i32
    %79 = arith.muli %c4_i32, %c384_i32_50 : i32
    %80 = tpu.assume_multiple %79, 128 : i32
    %c0_51 = arith.constant 0 : index
    %81 = arith.index_cast %80 : i32 to index
    %82 = vector.load %arg2[%c0_51, %81] : memref<48x1920xf32, #tpu.memory_space<vmem>>, vector<48x384xf32>
    %cst_52 = arith.constant dense<0.000000e+00> : vector<8x384xf32>
    %83 = tpu.matmul %0, %82, %cst_52 {dimension_numbers = #tpu.dot_dimension_numbers<[1], [0], [0], [1], [0, 0, 1, 1], [], []>} : vector<8x48xf32>, vector<48x384xf32>, vector<8x384xf32> -> vector<8x384xf32>
    %c0_53 = arith.constant 0 : index
    %84 = arith.index_cast %80 : i32 to index
    %85 = vector.load %arg3[%c0_53, %84] : memref<1x1920xf32, #tpu.memory_space<vmem>>, vector<1x384xf32>
    %86 = vector.broadcast %85 : vector<1x384xf32> to vector<8x384xf32>
    %87 = arith.addf %83, %86 : vector<8x384xf32>
    %cst_54 = arith.constant 0.000000e+00 : f32
    %88 = vector.broadcast %cst_54 : f32 to vector<8x384xf32>
    %89 = arith.maximumf %87, %88 : vector<8x384xf32>
    %90 = arith.truncf %89 : vector<8x384xf32> to vector<8x384xbf16>
    %c0_55 = arith.constant 0 : index
    %c0_56 = arith.constant 0 : index
    %91 = vector.load %arg10[%c0_55, %c0_56] : memref<8x128xf32, #tpu.memory_space<vmem>>, vector<8x128xf32>
    %92 = arith.index_cast %80 : i32 to index
    %c0_57 = arith.constant 0 : index
    %93 = vector.load %arg5[%92, %c0_57] : memref<1920x128xbf16, #tpu.memory_space<vmem>>, vector<384x128xbf16>
    %cst_58 = arith.constant dense<0.000000e+00> : vector<8x128xf32>
    %94 = tpu.matmul %90, %93, %cst_58 {dimension_numbers = #tpu.dot_dimension_numbers<[1], [0], [0], [1], [0, 0, 1, 1], [], []>} : vector<8x384xbf16>, vector<384x128xbf16>, vector<8x128xf32> -> vector<8x128xf32>
    %95 = arith.addf %91, %94 : vector<8x128xf32>
    %c0_59 = arith.constant 0 : index
    %c0_60 = arith.constant 0 : index
    %96 = vector.load %arg10[%c0_59, %c0_60] : memref<8x128xf32, #tpu.memory_space<vmem>>, vector<8x128xf32>
    tpu.vector_store %arg10[%c0_59, %c0_60], %95 {strides = array<i32>} : memref<8x128xf32, #tpu.memory_space<vmem>>, vector<8x128xf32>,
    %c5_i32 = arith.constant 5 : i32
    %c0_61 = arith.constant 0 : index
    %c0_62 = arith.constant 0 : index
    %97 = vector.load %arg10[%c0_61, %c0_62] : memref<8x128xf32, #tpu.memory_space<vmem>>, vector<8x128xf32>
    %cst_63 = arith.constant 0.000000e+00 : f32
    %98 = vector.broadcast %cst_63 : f32 to vector<8x128xf32>
    %99 = arith.maximumf %97, %98 : vector<8x128xf32>
    %c0_64 = arith.constant 0 : index
    %c0_65 = arith.constant 0 : index
    %100 = vector.load %arg7[%c0_64, %c0_65] : memref<128x128xf32, #tpu.memory_space<vmem>>, vector<128x128xf32>
    %cst_66 = arith.constant dense<0.000000e+00> : vector<8x128xf32>
    %101 = tpu.matmul %99, %100, %cst_66 {dimension_numbers = #tpu.dot_dimension_numbers<[1], [0], [0], [1], [0, 0, 1, 1], [], []>} : vector<8x128xf32>, vector<128x128xf32>, vector<8x128xf32> -> vector<8x128xf32>
    %c0_67 = arith.constant 0 : index
    %c0_68 = arith.constant 0 : index
    %102 = vector.load %arg8[%c0_67, %c0_68] : memref<1x128xf32, #tpu.memory_space<vmem>>, vector<1x128xf32>
    %103 = vector.broadcast %102 : vector<1x128xf32> to vector<8x128xf32>
    %104 = arith.addf %101, %103 : vector<8x128xf32>
    %cst_69 = arith.constant dense<0xFF800000> : vector<8xf32>
    %105 = vector.multi_reduction <maximumf>, %104, %cst_69 [1] : vector<8x128xf32> to vector<8xf32>
    %106 = vector.shape_cast %105 : vector<8xf32> to vector<8x1xf32>
    %107 = vector.broadcast %106 : vector<8x1xf32> to vector<8x128xf32>
    %108 = arith.subf %104, %107 : vector<8x128xf32>
    %109 = math.exp %108 : vector<8x128xf32>
    %cst_70 = arith.constant dense<0.000000e+00> : vector<8xf32>
    %110 = vector.multi_reduction <add>, %109, %cst_70 [1] : vector<8x128xf32> to vector<8xf32>
    %111 = vector.shape_cast %110 : vector<8xf32> to vector<8x1xf32>
    %112 = tpu.reciprocal %111 : vector<8x1xf32> -> vector<8x1xf32>
    %113 = vector.broadcast %112 : vector<8x1xf32> to vector<8x128xf32>
    %114 = arith.mulf %109, %113 : vector<8x128xf32>
    %c0_71 = arith.constant 0 : index
    %c0_72 = arith.constant 0 : index
    %115 = vector.load %arg9[%c0_71, %c0_72] : memref<8x128xf32, #tpu.memory_space<vmem>>, vector<8x128xf32>
    tpu.vector_store %arg9[%c0_71, %c0_72], %114 {strides = array<i32>} : memref<8x128xf32, #tpu.memory_space<vmem>>, vector<8x128xf32>,
    return
  }
  func.func @transform_0(%arg0: i32) -> (i32, i32) {
    %c0_i32 = arith.constant 0 : i32
    %c0_i32_0 = arith.constant 0 : i32
    return %arg0, %c0_i32 : i32, i32
  }
  func.func @transform_1(%arg0: i32) -> (i32, i32) {
    %c0_i32 = arith.constant 0 : i32
    %c0_i32_0 = arith.constant 0 : i32
    %c0_i32_1 = arith.constant 0 : i32
    return %c0_i32, %c0_i32_0 : i32, i32
  }
  func.func @transform_2(%arg0: i32) -> (i32, i32) {
    %c0_i32 = arith.constant 0 : i32
    %c0_i32_0 = arith.constant 0 : i32
    %c0_i32_1 = arith.constant 0 : i32
    return %c0_i32, %c0_i32_0 : i32, i32
  }
  func.func @transform_3(%arg0: i32) -> (i32, i32) {
    %c0_i32 = arith.constant 0 : i32
    %c0_i32_0 = arith.constant 0 : i32
    %c0_i32_1 = arith.constant 0 : i32
    return %c0_i32, %c0_i32_0 : i32, i32
  }
  func.func @transform_4(%arg0: i32) -> (i32, i32) {
    %c0_i32 = arith.constant 0 : i32
    %c0_i32_0 = arith.constant 0 : i32
    %c0_i32_1 = arith.constant 0 : i32
    return %c0_i32, %c0_i32_0 : i32, i32
  }
  func.func @transform_5(%arg0: i32) -> (i32, i32) {
    %c0_i32 = arith.constant 0 : i32
    %c0_i32_0 = arith.constant 0 : i32
    %c0_i32_1 = arith.constant 0 : i32
    return %c0_i32, %c0_i32_0 : i32, i32
  }
  func.func @transform_6(%arg0: i32) -> (i32, i32) {
    %c0_i32 = arith.constant 0 : i32
    %c0_i32_0 = arith.constant 0 : i32
    %c0_i32_1 = arith.constant 0 : i32
    return %c0_i32, %c0_i32_0 : i32, i32
  }
  func.func @transform_7(%arg0: i32) -> (i32, i32) {
    %c0_i32 = arith.constant 0 : i32
    %c0_i32_0 = arith.constant 0 : i32
    %c0_i32_1 = arith.constant 0 : i32
    return %c0_i32, %c0_i32_0 : i32, i32
  }
  func.func @transform_8(%arg0: i32) -> (i32, i32) {
    %c0_i32 = arith.constant 0 : i32
    %c0_i32_0 = arith.constant 0 : i32
    return %arg0, %c0_i32 : i32, i32
  }
}

</mosaic_0001>

<bundles_post_ra>
// kernel: actor_forward.1
= control target key start
LH: loop header
LB: loop body
LE: loop exit
PB: predicated region body
PF: predicated region fallthrough
CT: control target
= control target key end

     0   :  { %13 = vsyncpa [#allocation4], 0  ;;  %s3640_s0 = inlined_call_operand.vmem [shape: f32[8,48], index: 0, kind: input, shape index: {}]   ;;  %s3641_s1 = inlined_call_operand.hbm [shape: f32[48,1920], index: 1, kind: input, shape index: {}]   ;;  %s3642_s2 = inlined_call_operand.vmem [shape: f32[1,1920], index: 2, kind: input, shape index: {}]   ;;  %s3643_s3 = inlined_call_operand.vmem [shape: f32[48,128], index: 3, kind: input, shape index: {}]   ;;  %s3644_s4 = inlined_call_operand.hbm [shape: bf16[1920,128], index: 4, kind: input, shape index: {}]   ;;  %s3645_s5 = inlined_call_operand.vmem [shape: f32[1,128], index: 5, kind: input, shape index: {}]   ;;  %s3646_s6 = inlined_call_operand.hbm [shape: f32[128,128], index: 6, kind: input, shape index: {}]   ;;  %s3647_s7 = inlined_call_operand.vmem [shape: f32[1,128], index: 7, kind: input, shape index: {}]   ;;  %s3648_s8 = inlined_call_operand.vmem [shape: f32[8,128], index: 8, kind: output, shape index: {}]  }
   0x1   :  { %14 = vsyncpa [#allocation6], 0  ;;  %s3344_s27 = smov [#allocation5]  }
   0x2   :  { %s38_s28 = sshll.u32 %s3344_s27, 4  ;;  %s39_s28 = int_to_ptr.vmem [resolvable:$true] %s38_s28 }
   0x3   :  { %s3288_s29 = scalar_lea.vmem %s39_s28, 15360  ;;  %p3293_p1 = scmp.lt.s32.totalorder %s39_s28, %s39_s28 }
   0x4   :  { %p3289_p0 = scmp.ne.s32.totalorder %s39_s28, %s3288_s29  ;;  %p3294_p2 = scmp.lt.s32.totalorder %s3288_s29, %s3288_s29 }
   0x6   :  { %p3295_p3 = por %p3294_p2, %p3293_p1 }
   0x8   :  { %p3296_p4 = pnand %p3295_p3, %p3289_p0 }
   0xa   :  { %3299 = shalt.err (!%p3296_p4)
}
   0xb   :  { %s3345_s30 = smov 64   ;;  %s3346_s9 = smov 4  }
   0xc   :  { %44 = dma.hbm_to_vmem [thread:$0]  %s3644_s4, 15360, %s39_s28, [#allocation6], %s3345_s30, %s3345_s30, %s3346_s9  }
   0xd   :  { %s3347_s12 = smov [#allocation3]  }
   0xe   :  { %s22_s13 = sshll.u32 %s3347_s12, 4  ;;  %s23_s13 = int_to_ptr.vmem [resolvable:$true] %s22_s13 }
   0xf   :  { %s3308_s14 = scalar_lea.vmem %s23_s13, 11520  ;;  %p3313_p6 = scmp.lt.s32.totalorder %s23_s13, %s23_s13 }
  0x10   :  { %p3309_p5 = scmp.ne.s32.totalorder %s23_s13, %s3308_s14  ;;  %p3314_p7 = scmp.lt.s32.totalorder %s3308_s14, %s3308_s14 }
  0x12   :  { %p3315_p8 = por %p3314_p7, %p3313_p6 }
  0x14   :  { %p3316_p9 = pnand %p3315_p8, %p3309_p5 }
  0x16   :  { %3319 = shalt.err (!%p3316_p9)
}
  0x17   :  { %s3348_s15 = smov 1920   ;;  %s3349_s16 = smov 120  }
  0x18   :  { %28 = dma.hbm_to_vmem [thread:$0]  %s3641_s1, 11520, %s23_s13, [#allocation4], %s3348_s15, %s3348_s15, %s3349_s16  }
  0x19   :  { %s3350_s19 = smov [#allocation7]  }
  0x1a   :  { %s52_s20 = sshll.u32 %s3350_s19, 4  ;;  %s53_s20 = int_to_ptr.vmem [resolvable:$true] %s52_s20 }
  0x1b   :  { %s3328_s4 = scalar_lea.vmem %s53_s20, 2048  ;;  %p3333_p11 = scmp.lt.s32.totalorder %s53_s20, %s53_s20 }
  0x1c   :  { %p3329_p10 = scmp.ne.s32.totalorder %s53_s20, %s3328_s4  ;;  %p3334_p12 = scmp.lt.s32.totalorder %s3328_s4, %s3328_s4 }
  0x1e   :  { %p3335_p13 = por %p3334_p12, %p3333_p11 }
  0x20   :  { %p3336_p0 = pnand %p3335_p13, %p3329_p10 }
  0x22   :  { %3339 = shalt.err (!%p3336_p0)
}
  0x23   :  { %s3351_s21 = smov 128   ;;  %s3352_s22 = smov 8  }
  0x24   :  { %58 = dma.hbm_to_vmem [thread:$0]  %s3646_s6, 2048, %s53_s20, [#allocation6], %s3351_s21, %s3351_s21, %s3352_s22  }
  0x25   :  { %3340 = dma.done.wait [#allocation4], 11520  }
  0x26   :  { %3341 = vsyncadd [#allocation4], 4294955776 }
  0x27   :  { %3342 = dma.done.wait [#allocation6], 17408  }
  0x28   :  { %3343 = vsyncadd [#allocation6], 4294949888  ;;  %v3353_v0 = vmov 0.0   ;;  %vm3354_vm0 = vmmov 0   ;;  %v77_v1 = vld [vmem:[%s3643_s3 + $0x28] sm:$0xff]  ;;  %v76_v2 = vld [vmem:[%s3643_s3 + $0x20] sm:$0xff]  ;;  %v180_v51 = vlaneseq }
  0x29   :  { %2919 = vmatprep.subr.mxu0 %v3353_v0  ;;  %2931 = vmatprep.mubr.msk.f32.mxu0 %vm3354_vm0, %v3353_v0  ;;  %v75_v3 = vld [vmem:[%s3643_s3 + $0x18] sm:$0xff]  ;;  %v74_v4 = vld [vmem:[%s3643_s3 + $0x10] sm:$0xff]  ;;  %v73_v5 = vld [vmem:[%s3643_s3 + $0x8] sm:$0xff]  ;;  %vm85_vm1 = vcmask 392192  }
  0x2a   :  { %2920 = vmatpush3.msra.mxu0 %v77_v1  ;;  %v72_v6 = vld [vmem:[%s3643_s3] sm:$0xff]  ;;  %v175_v9 = vld [vmem:[#allocation3 + $0x258] sm:$0xff]  ;;  %v173_v10 = vld [vmem:[#allocation3 + $0x1e8] sm:$0xff]  ;;  %v181_v53 = vshrl.u32 %v180_v51, 7 }
  0x2b   :  { %2921 = vmatprep.subr.mxu0 %v3353_v0  ;;  %v3436_v7 = vld [vmem:[%s3640_s0] sm:$0xff]  ;;  %v3155_v11 = vld [vmem:[#allocation5 + $0x78] sm:$0xff]   ;;  %v170_v14 = vld [vmem:[#allocation3 + $0x170] sm:$0xff] }
  0x2c   :  { %2922 = vmatpush3.msra.mxu0 %v76_v2  ;;  %v176_v8 = vld [vmem:[#allocation3 + $0x260] sm:$0xff]  ;;  %v3156_v13 = vld [vmem:[#allocation5 + $0x38] sm:$0xff]   ;;  %2719 = vmatprep.subr.bf16.mxu1 %v3155_v11  ;;  %v167_v17 = vld [vmem:[#allocation3 + $0xf8] sm:$0xff]  ;;  %v3468_v55 = vsub.s32 0, %v181_v53  ;;  %v3473_v57 = vsub.s32 1, %v181_v53 }
  0x2d   :  { %2923 = vmatprep.subr.mxu0 %v3353_v0  ;;  %v172_v12 = vld [vmem:[#allocation3 + $0x1e0] sm:$0xff]  ;;  %v169_v16 = vld [vmem:[#allocation3 + $0x168] sm:$0xff]  ;;  %v166_v18 = vld [vmem:[#allocation3 + $0xf0] sm:$0xff]  ;;  %2720 = vmatpush3.bf16.msra.mxu1 %v3156_v13 }
  0x2e   :  { %2924 = vmatpush3.msra.mxu0 %v75_v3  ;;  %v3157_v15 = vld [vmem:[#allocation5 + $0x70] sm:$0xff]   ;;  %v3159_v21 = vld [vmem:[#allocation5 + $0x68] sm:$0xff]   ;;  %v161_v24 = vld [vmem:[#allocation3 + $0x8] sm:$0xff]  ;;  %v3477_v3 = vsub.s32 2, %v181_v53 }
  0x2f   :  { %2925 = vmatprep.subr.mxu0 %v3353_v0  ;;  %v3158_v19 = vld [vmem:[#allocation5 + $0x30] sm:$0xff]   ;;  %2721 = vmatprep.subr.bf16.mxu1 %v3157_v15  ;;  %v163_v22 = vld [vmem:[#allocation3 + $0x78] sm:$0xff]  ;;  %v177_v26 = vld [vmem:[#allocation3 + $0x268] sm:$0xff] }
  0x30   :  { %2926 = vmatpush3.msra.mxu0 %v74_v4  ;;  %v164_v20 = vld [vmem:[#allocation3 + $0x80] sm:$0xff]  ;;  %v3160_v23 = vld [vmem:[#allocation5 + $0x28] sm:$0xff]   ;;  %v174_v27 = vld [vmem:[#allocation3 + $0x1f0] sm:$0xff] }
  0x31   :  { %2927 = vmatprep.subr.mxu0 %v3353_v0  ;;  %v160_v25 = vld [vmem:[#allocation3] sm:$0xff]  ;;  %2722 = vmatpush3.bf16.msra.mxu1 %v3158_v19  ;;  %v171_v28 = vld [vmem:[#allocation3 + $0x178] sm:$0xff]  ;;  %v165_v30 = vld [vmem:[#allocation3 + $0x88] sm:$0xff] }
  0x32   :  { %2928 = vmatpush3.msra.mxu0 %v73_v5  ;;  %2723 = vmatprep.subr.bf16.mxu1 %v3159_v21  ;;  %v168_v29 = vld [vmem:[#allocation3 + $0x100] sm:$0xff]  ;;  %v162_v31 = vld [vmem:[#allocation3 + $0x10] sm:$0xff]  ;;  %v3161_v32 = vld [vmem:[#allocation5 + $0xb8] sm:$0xff]  }
  0x33   :  { %2929 = vmatprep.subr.mxu0 %v3353_v0  ;;  %v3162_v33 = vld [vmem:[#allocation5 + $0x60] sm:$0xff]   ;;  %v3164_v35 = vld [vmem:[#allocation5 + $0xb0] sm:$0xff]   ;;  %v3165_v36 = vld [vmem:[#allocation5 + $0x58] sm:$0xff]  }
  0x34   :  { %2930 = vmatpush3.msra.mxu0 %v72_v6  ;;  %v3163_v34 = vld [vmem:[#allocation5 + $0x20] sm:$0xff]   ;;  %v3166_v37 = vld [vmem:[#allocation5 + $0x18] sm:$0xff]   ;;  %v3167_v38 = vld [vmem:[#allocation5 + $0xa8] sm:$0xff]  }
  0x35   :  { %2932 = vmatmul.mubr.msk.f32.vlgmr.msra.gmra.mxu0 %vm85_vm1, %v3436_v7  ;;  %215 = vmatprep.subr.mxu0 %v176_v8  ;;  %v3168_v39 = vld [vmem:[#allocation5 + $0x50] sm:$0xff]   ;;  %v3170_v41 = vld [vmem:[#allocation5 + $0xa0] sm:$0xff]   ;;  %v3171_v42 = vld [vmem:[#allocation5 + $0x48] sm:$0xff]  }
  0x36   :  { %216 = vmatpush1.msra.mxu0 %v175_v9  ;;  %259 = vmatprep.mubr.f32.mxu0 %v3353_v0  ;;  %v3169_v40 = vld [vmem:[#allocation5 + $0x10] sm:$0xff]   ;;  %v3172_v43 = vld [vmem:[#allocation5 + $0x8] sm:$0xff]   ;;  %v3173_v44 = vld [vmem:[#allocation5 + $0x98] sm:$0xff]  }
  0x37   :  { %217 = vmatprep.subr.mxu0 %v173_v10  ;;  %2724 = vmatpush3.bf16.msra.mxu1 %v3160_v23  ;;  %v3174_v45 = vld [vmem:[#allocation5 + $0x40] sm:$0xff]   ;;  %v3176_v47 = vld [vmem:[#allocation5 + $0x90] sm:$0xff]   ;;  %v634_v48 = vld [vmem:[#allocation3 + $0x278] sm:$0xff] }
  0x38   :  { %218 = vmatpush1.msra.mxu0 %v172_v12  ;;  %2725 = vmatprep.subr.bf16.mxu1 %v3162_v33  ;;  %v3175_v46 = vld [vmem:[#allocation5] sm:$0xff]   ;;  %v3177_v49 = vld [vmem:[#allocation5 + $0x88] sm:$0xff]   ;;  %v178_v56 = vld [vmem:[%s3642_s2] sm:$0x7] }
  0x39   :  { %219 = vmatprep.subr.mxu0 %v170_v14  ;;  %v3178_v50 = vld [vmem:[#allocation5 + $0x80] sm:$0xff]   ;;  %v183_v58 = vrot.slane %v178_v56, %v3468_v55  ;;  %v187_v59 = vrot.slane %v178_v56, %v3473_v57  ;;  %v631_v8 = vld [vmem:[#allocation3 + $0x200] sm:$0xff]  ;;  %v191_v9 = vrot.slane %v178_v56, %v3477_v3  ;;  %v630_v10 = vld [vmem:[#allocation3 + $0x1f8] sm:$0xff] }
  0x3a   :  { %220 = vmatpush1.msra.mxu0 %v169_v16  ;;  %v633_v6 = vld [vmem:[#allocation3 + $0x270] sm:$0xff]  ;;  %v628_v11 = vld [vmem:[#allocation3 + $0x188] sm:$0xff]  ;;  %v627_v13 = vld [vmem:[#allocation3 + $0x180] sm:$0xff] }
  0x3b   :  { %221 = vmatprep.subr.mxu0 %v167_v17  ;;  %2726 = vmatpush3.bf16.msra.mxu1 %v3163_v34  ;;  %v625_v15 = vld [vmem:[#allocation3 + $0x110] sm:$0xff]  ;;  %v624_v16 = vld [vmem:[#allocation3 + $0x108] sm:$0xff]  ;;  %v622_v19 = vld [vmem:[#allocation3 + $0x98] sm:$0xff] }
  0x3c   :  { %222 = vmatpush1.msra.mxu0 %v166_v18  ;;  %2727 = vmatprep.subr.bf16.mxu1 %v3165_v36  ;;  %v635_v23 = vld [vmem:[#allocation3 + $0x280] sm:$0xff]  ;;  %v3183_v33 = vld [vmem:[#allocation5 + $0x128] sm:$0xff]   ;;  %v620_v34 = vld [vmem:[#allocation3 + $0x28] sm:$0xff] }
  0x3d   :  { %223 = vmatprep.subr.mxu0 %v164_v20  ;;  %v621_v20 = vld [vmem:[#allocation3 + $0x90] sm:$0xff]  ;;  %v3185_v36 = vld [vmem:[#allocation5 + $0xe8] sm:$0xff]  }
  0x3e   :  { %224 = vmatpush1.msra.mxu0 %v163_v22  ;;  %v619_v22 = vld [vmem:[#allocation3 + $0x20] sm:$0xff]  ;;  %v3201_v51 = vld [vmem:[#allocation5 + $0x148] sm:$0xff]   ;;  %v1094_v53 = vld [vmem:[#allocation3 + $0x290] sm:$0xff] }
  0x3f   :  { %225 = vmatprep.subr.mxu0 %v161_v24  ;;  %2728 = vmatpush3.bf16.msra.mxu1 %v3166_v37  ;;  %v618_v24 = vld [vmem:[#allocation3 + $0x18] sm:$0xff]  ;;  %v3186_v37 = vld [vmem:[#allocation5 + $0x120] sm:$0xff]  }
  0x40   :  { %226 = vmatpush1.msra.mxu0 %v160_v25  ;;  %2729 = vmatprep.subr.bf16.mxu1 %v3168_v39  ;;  %v632_v25 = vld [vmem:[#allocation3 + $0x208] sm:$0xff]  ;;  %v3188_v39 = vld [vmem:[#allocation5 + $0xe0] sm:$0xff]  }
  0x41   :  { %2570 = vmatmul.mubr.msk.f32.vlgmr.msra.gmra.mxu0 %vm85_vm1, %v3436_v7  ;;  %2934 = vmatprep.subr.mxu0 %v3353_v0 }
  0x42   :  { %2935 = vmatpush3.msra.mxu0 %v177_v26  ;;  %2946 = vmatprep.mubr.msk.f32.mxu0 %vm3354_vm0, %v3353_v0  ;;  %v3179_v26 = vld [vmem:[#allocation5 + $0x138] sm:$0xff]  }
  0x43   :  { %2936 = vmatprep.subr.mxu0 %v3353_v0  ;;  %2730 = vmatpush3.bf16.msra.mxu1 %v3169_v40  ;;  %v3189_v40 = vld [vmem:[#allocation5 + $0x118] sm:$0xff]  }
  0x44   :  { %2937 = vmatpush3.msra.mxu0 %v174_v27  ;;  %2731 = vmatprep.subr.bf16.mxu1 %v3171_v42  ;;  %v629_v27 = vld [vmem:[#allocation3 + $0x190] sm:$0xff]  ;;  %v3192_v42 = vld [vmem:[#allocation5 + $0x110] sm:$0xff]  }
  0x45   :  { %2938 = vmatprep.subr.mxu0 %v3353_v0 }
  0x46   :  { %2939 = vmatpush3.msra.mxu0 %v171_v28  ;;  %v3180_v28 = vld [vmem:[#allocation5 + $0xf8] sm:$0xff]  }
  0x47   :  { %2940 = vmatprep.subr.mxu0 %v3353_v0  ;;  %2732 = vmatpush3.bf16.msra.mxu1 %v3172_v43  ;;  %v3193_v43 = vld [vmem:[#allocation5 + $0x160] sm:$0xff]  }
  0x48   :  { %2941 = vmatpush3.msra.mxu0 %v168_v29  ;;  %2733 = vmatprep.subr.bf16.mxu1 %v3174_v45  ;;  %v3181_v29 = vld [vmem:[#allocation5 + $0x130] sm:$0xff]   ;;  %v3195_v45 = vld [vmem:[#allocation5 + $0x108] sm:$0xff]  }
  0x49   :  { %2942 = vmatprep.subr.mxu0 %v3353_v0 }
  0x4a   :  { %2943 = vmatpush3.msra.mxu0 %v165_v30  ;;  %v626_v30 = vld [vmem:[#allocation3 + $0x118] sm:$0xff] }
  0x4b   :  { %2944 = vmatprep.subr.mxu0 %v3353_v0  ;;  %2734 = vmatpush3.bf16.msra.mxu1 %v3175_v46  ;;  %v3196_v46 = vld [vmem:[#allocation5 + $0x158] sm:$0xff]  }
  0x4c   :  { %2945 = vmatpush3.msra.mxu0 %v162_v31  ;;  %674 = vmatprep.subr.mxu1 %v634_v48  ;;  %v623_v31 = vld [vmem:[#allocation3 + $0xa0] sm:$0xff]  ;;  %v3198_v48 = vld [vmem:[#allocation5 + $0x100] sm:$0xff]  }
  0x4d   :  { %2947 = vmatmul.mubr.msk.f32.vlgmr.msra.gmra.mxu0 %vm85_vm1, %v3436_v7  ;;  %2949 = vmatprep.subr.bf16.mxu0 %v3353_v0 }
  0x4e   :  { %2950 = vmatpush3.bf16.msra.mxu0 %v3161_v32  ;;  %2965 = vmatprep.mubr.msk.bf16.mxu0 %vm3354_vm0, %v3353_v0  ;;  %v3182_v32 = vld [vmem:[#allocation5 + $0xf0] sm:$0xff]  }
  0x4f   :  { %2951 = vmatprep.subr.bf16.mxu0 %v3353_v0 }
  0x52   :  { %2952 = vmatpush3.bf16.msra.mxu0 %v3164_v35  ;;  %v3184_v35 = vld [vmem:[#allocation5 + $0x178] sm:$0xff]  }
  0x53   :  { %2953 = vmatprep.subr.bf16.mxu0 %v3353_v0 }
  0x56   :  { %2954 = vmatpush3.bf16.msra.mxu0 %v3167_v38  ;;  %v3187_v38 = vld [vmem:[#allocation5 + $0x170] sm:$0xff]  }
  0x57   :  { %2955 = vmatprep.subr.bf16.mxu0 %v3353_v0 }
  0x5a   :  { %2956 = vmatpush3.bf16.msra.mxu0 %v3170_v41  ;;  %v3190_v41 = vld [vmem:[#allocation5 + $0x168] sm:$0xff]  }
  0x5b   :  { %2957 = vmatprep.subr.bf16.mxu0 %v3353_v0 }
  0x5e   :  { %2958 = vmatpush3.bf16.msra.mxu0 %v3173_v44  ;;  %v3194_v44 = vld [vmem:[#allocation5 + $0xd0] sm:$0xff]  }
  0x5f   :  { %2959 = vmatprep.subr.bf16.mxu0 %v3353_v0 }
  0x62   :  { %2960 = vmatpush3.bf16.msra.mxu0 %v3176_v47  ;;  %v3197_v47 = vld [vmem:[#allocation5 + $0xc8] sm:$0xff]  }
  0x63   :  { %2961 = vmatprep.subr.bf16.mxu0 %v3353_v0 }
  0x66   :  { %2962 = vmatpush3.bf16.msra.mxu0 %v3177_v49  ;;  %v3199_v49 = vld [vmem:[#allocation5 + $0x150] sm:$0xff]  }
  0x67   :  { %2963 = vmatprep.subr.bf16.mxu0 %v3353_v0 }
  0x6a   :  { %2964 = vmatpush3.bf16.msra.mxu0 %v3178_v50  ;;  %v3200_v50 = vld [vmem:[#allocation5 + $0xc0] sm:$0xff]  }
  0x6b   :  { %2969 = vmatprep.subr.mxu0 %v3353_v0 }
  0xf5   :  { %v3466_v52 = vpop.f32.mrf.mxu0 }
  0xf7   :  { %v2933_v54 = vpop.f32.mrf.mxu0 }
  0xf8   :  { %v3202_v54 = vld [vmem:[#allocation5 + $0x140] sm:$0xff]  }
 0x101   :  { %v261_v60 = vpop.f32.mrf.mxu0 }
 0x102   :  { %v262_v61 = vadd.f32 %v261_v60, %v183_v58 }
 0x103   :  { %v263_v62 = vpop.f32.mrf.mxu0 }
 0x104   :  { %v264_v63 = vadd.f32 %v263_v62, %v187_v59  ;;  %v336_v1 = vmax.f32 %v262_v61, 0.0  ;;  %v2596_v62 = vld [vmem:[%s3642_s2 + $0x3] sm:$0x7] }
 0x106   :  { %v337_v2 = vmax.f32 %v264_v63, 0.0  ;;  %v339_v5 = vpack.c.bf16 %v336_v1, %v336_v1  ;;  %v2568_v63 = vld [vmem:[%s3645_s5] ss:$0 sm:$0xff] }
 0x108   :  { %v340_v4 = vpack.c.bf16 %v337_v2, %v337_v2  ;;  %v642_v2 = vrot.slane %v2596_v62, %v3468_v55 }
 0x10a   :  { %567 = vmatprep.mubr.bf16.mxu1 %v340_v4  ;;  %v156_v4 = vadd.f32 %v2568_v63, %v3466_v52  ;;  %v3221_v63 = vld [vmem:[#allocation5 + $0x188] sm:$0xff]  }
 0x10b   :  { %568 = vmatmul.mubr.bf16.vlgmr.msra.gmra.mxu1 %v339_v5 }
 0x10c   :  { %675 = vmatpush1.msra.mxu1 %v633_v6  ;;  %718 = vmatprep.mubr.f32.mxu1 %v3353_v0 }
 0x10d   :  { %676 = vmatprep.subr.mxu1 %v631_v8  ;;  %v332_v12 = vpop.f32.mrf.mxu0  ;;  %v646_v8 = vrot.slane %v2596_v62, %v3473_v57 }
 0x10e   :  { %v333_v14 = vadd.f32 %v332_v12, %v191_v9  ;;  %677 = vmatpush1.msra.mxu1 %v630_v10 }
 0x10f   :  { %678 = vmatprep.subr.mxu1 %v628_v11  ;;  %v2948_v17 = vpop.f32.mrf.mxu0 }
 0x110   :  { %v338_v18 = vmax.f32 %v333_v14, 0.0  ;;  %679 = vmatpush1.msra.mxu1 %v627_v13 }
 0x111   :  { %680 = vmatprep.subr.mxu1 %v625_v15 }
 0x112   :  { %v341_v21 = vpack.c.bf16 %v338_v18, %v338_v18  ;;  %681 = vmatpush1.msra.mxu1 %v624_v16  ;;  %v650_v18 = vrot.slane %v2596_v62, %v3477_v3  ;;  %v3220_v62 = vld [vmem:[#allocation5 + $0x1c8] sm:$0xff]  }
 0x113   :  { %682 = vmatprep.subr.mxu1 %v622_v19 }
 0x114   :  { %683 = vmatpush1.msra.mxu1 %v621_v20  ;;  %2966 = vmatmul.mubr.bf16.vlgmr.msra.gmra.mxu0 %v341_v21  ;;  %v1093_v21 = vld [vmem:[#allocation3 + $0x288] sm:$0xff] }
 0x115   :  { %684 = vmatprep.subr.mxu1 %v619_v22  ;;  %2970 = vmatpush3.msra.mxu0 %v635_v23  ;;  %v1091_v22 = vld [vmem:[#allocation3 + $0x218] sm:$0xff] }
 0x116   :  { %685 = vmatpush1.msra.mxu1 %v618_v24  ;;  %2971 = vmatprep.subr.mxu0 %v3353_v0  ;;  %v1090_v24 = vld [vmem:[#allocation3 + $0x210] sm:$0xff] }
 0x117   :  { %2597 = vmatmul.mubr.msk.f32.vlgmr.msra.gmra.mxu1 %vm85_vm1, %v3436_v7  ;;  %2972 = vmatpush3.msra.mxu0 %v632_v25  ;;  %v1088_v25 = vld [vmem:[#allocation3 + $0x1a0] sm:$0xff] }
 0x118   :  { %2973 = vmatprep.subr.mxu0 %v3353_v0  ;;  %2981 = vmatprep.mubr.msk.f32.mxu0 %vm3354_vm0, %v3353_v0 }
 0x119   :  { %2974 = vmatpush3.msra.mxu0 %v629_v27  ;;  %2757 = vmatprep.subr.bf16.mxu1 %v3179_v26 }
 0x11a   :  { %2975 = vmatprep.subr.mxu0 %v3353_v0  ;;  %2758 = vmatpush3.bf16.msra.mxu1 %v3180_v28  ;;  %v1087_v28 = vld [vmem:[#allocation3 + $0x198] sm:$0xff] }
 0x11b   :  { %2976 = vmatpush3.msra.mxu0 %v626_v30  ;;  %2759 = vmatprep.subr.bf16.mxu1 %v3181_v29  ;;  %v1085_v29 = vld [vmem:[#allocation3 + $0x128] sm:$0xff] }
 0x11c   :  { %2977 = vmatprep.subr.mxu0 %v3353_v0 }
 0x11d   :  { %2978 = vmatpush3.msra.mxu0 %v623_v31  ;;  %v1084_v31 = vld [vmem:[#allocation3 + $0x120] sm:$0xff] }
 0x11e   :  { %2979 = vmatprep.subr.mxu0 %v3353_v0  ;;  %2760 = vmatpush3.bf16.msra.mxu1 %v3182_v32  ;;  %v1095_v32 = vld [vmem:[#allocation3 + $0x298] sm:$0xff] }
 0x11f   :  { %2980 = vmatpush3.msra.mxu0 %v620_v34  ;;  %2761 = vmatprep.subr.bf16.mxu1 %v3183_v33  ;;  %v1082_v33 = vld [vmem:[#allocation3 + $0xb0] sm:$0xff]  ;;  %v1081_v34 = vld [vmem:[#allocation3 + $0xa8] sm:$0xff] }
 0x120   :  { %2982 = vmatmul.mubr.msk.f32.vlgmr.msra.gmra.mxu0 %vm85_vm1, %v3436_v7  ;;  %2984 = vmatprep.subr.bf16.mxu0 %v3353_v0  ;;  %v3191_v7 = vld [vmem:[#allocation5 + $0xd8] sm:$0xff]  }
 0x121   :  { %2985 = vmatpush3.bf16.msra.mxu0 %v3184_v35  ;;  %3000 = vmatprep.mubr.msk.bf16.mxu0 %vm3354_vm0, %v3353_v0  ;;  %v1092_v35 = vld [vmem:[#allocation3 + $0x220] sm:$0xff] }
 0x122   :  { %2762 = vmatpush3.bf16.msra.mxu1 %v3185_v36  ;;  %2986 = vmatprep.subr.bf16.mxu0 %v3353_v0  ;;  %v1079_v36 = vld [vmem:[#allocation3 + $0x38] sm:$0xff] }
 0x123   :  { %2763 = vmatprep.subr.bf16.mxu1 %v3186_v37  ;;  %v1078_v37 = vld [vmem:[#allocation3 + $0x30] sm:$0xff] }
 0x125   :  { %2987 = vmatpush3.bf16.msra.mxu0 %v3187_v38  ;;  %v1089_v38 = vld [vmem:[#allocation3 + $0x1a8] sm:$0xff] }
 0x126   :  { %2764 = vmatpush3.bf16.msra.mxu1 %v3188_v39  ;;  %2988 = vmatprep.subr.bf16.mxu0 %v3353_v0  ;;  %v1086_v39 = vld [vmem:[#allocation3 + $0x130] sm:$0xff] }
 0x127   :  { %2765 = vmatprep.subr.bf16.mxu1 %v3189_v40  ;;  %v3203_v40 = vld [vmem:[#allocation5 + $0x1f8] sm:$0xff]  }
 0x129   :  { %2989 = vmatpush3.bf16.msra.mxu0 %v3190_v41  ;;  %v3204_v41 = vld [vmem:[#allocation5 + $0x1b8] sm:$0xff]  }
 0x12a   :  { %2766 = vmatpush3.bf16.msra.mxu1 %v3191_v7  ;;  %2990 = vmatprep.subr.bf16.mxu0 %v3353_v0  ;;  %v3521_v7 = vld [vmem:[%s3640_s0] sm:$0xff] }
 0x12b   :  { %2767 = vmatprep.subr.bf16.mxu1 %v3192_v42  ;;  %v1083_v42 = vld [vmem:[#allocation3 + $0xb8] sm:$0xff] }
 0x12d   :  { %2991 = vmatpush3.bf16.msra.mxu0 %v3193_v43  ;;  %v3205_v43 = vld [vmem:[#allocation5 + $0x1f0] sm:$0xff]  }
 0x12e   :  { %2768 = vmatpush3.bf16.msra.mxu1 %v3194_v44  ;;  %2992 = vmatprep.subr.bf16.mxu0 %v3353_v0  ;;  %v1080_v44 = vld [vmem:[#allocation3 + $0x40] sm:$0xff] }
 0x12f   :  { %2769 = vmatprep.subr.bf16.mxu1 %v3195_v45  ;;  %v3206_v45 = vld [vmem:[#allocation5 + $0x1b0] sm:$0xff]  }
 0x131   :  { %2993 = vmatpush3.bf16.msra.mxu0 %v3196_v46  ;;  %v3207_v46 = vld [vmem:[#allocation5 + $0x238] sm:$0xff]  }
 0x132   :  { %2770 = vmatpush3.bf16.msra.mxu1 %v3197_v47  ;;  %2994 = vmatprep.subr.bf16.mxu0 %v3353_v0  ;;  %v3208_v47 = vld [vmem:[#allocation5 + $0x1e8] sm:$0xff]  }
 0x133   :  { %2771 = vmatprep.subr.bf16.mxu1 %v3198_v48  ;;  %v3209_v48 = vld [vmem:[#allocation5 + $0x1a8] sm:$0xff]  }
 0x135   :  { %2995 = vmatpush3.bf16.msra.mxu0 %v3199_v49  ;;  %v3210_v49 = vld [vmem:[#allocation5 + $0x230] sm:$0xff]  }
 0x136   :  { %2772 = vmatpush3.bf16.msra.mxu1 %v3200_v50  ;;  %2996 = vmatprep.subr.bf16.mxu0 %v3353_v0  ;;  %v3211_v50 = vld [vmem:[#allocation5 + $0x1e0] sm:$0xff]  }
 0x137   :  { %1134 = vmatprep.subr.mxu1 %v1094_v53  ;;  %v3213_v53 = vld [vmem:[#allocation5 + $0x228] sm:$0xff]  }
 0x139   :  { %2997 = vmatpush3.bf16.msra.mxu0 %v3201_v51  ;;  %v3212_v51 = vld [vmem:[#allocation5 + $0x1a0] sm:$0xff]  }
 0x13a   :  { %2998 = vmatprep.subr.bf16.mxu0 %v3353_v0 }
 0x13d   :  { %2999 = vmatpush3.bf16.msra.mxu0 %v3202_v54  ;;  %v3214_v54 = vld [vmem:[#allocation5 + $0x1d8] sm:$0xff]  }
 0x13e   :  { %3004 = vmatprep.subr.mxu0 %v3353_v0 }
 0x1cb   :  { %v2735_v56 = vpop.f32.mrf.mxu1 }
 0x1cd   :  { %v2736_v58 = vpop.f32.mrf.mxu1 }
 0x1ce   :  { %v2737_v59 = vadd.f32 %v2736_v58, %v2735_v56  ;;  %v3215_v56 = vld [vmem:[#allocation5 + $0x198] sm:$0xff]   ;;  %v3216_v58 = vld [vmem:[#allocation5 + $0x220] sm:$0xff]  }
 0x1cf   :  { %v2738_v60 = vpop.f32.mrf.mxu1 }
 0x1d0   :  { %v3218_v60 = vld [vmem:[#allocation5 + $0x190] sm:$0xff]  }
 0x1d1   :  { %v2739_v61 = vpop.f32.mrf.mxu1 }
 0x1d2   :  { %v3219_v61 = vld [vmem:[#allocation5 + $0x218] sm:$0xff]  }
 0x1d4   :  { %v609_v1 = vpop.f32.mrf.mxu0 }
 0x1d5   :  { %v610_v5 = vadd.f32 %v2737_v59, %v609_v1  ;;  %v3217_v59 = vld [vmem:[#allocation5 + $0x1d0] sm:$0xff]  }
 0x1d6   :  { %v2967_v6 = vpop.f32.mrf.mxu0  ;;  %v3222_v1 = vld [vmem:[#allocation5 + $0x210] sm:$0xff]  }
 0x1d7   :  { %v3512_v9 = vadd.f32 %v610_v5, %v156_v4  ;;  %v720_v10 = vpop.f32.mrf.mxu1  ;;  %v3224_v4 = vld [vmem:[#allocation5 + $0x180] sm:$0xff]   ;;  %v3225_v5 = vld [vmem:[#allocation5 + $0x208] sm:$0xff]   ;;  %v1554_v6 = vld [vmem:[#allocation3 + $0x2a8] sm:$0xff] }
 0x1d8   :  { %v721_v11 = vadd.f32 %v720_v10, %v642_v2  ;;  %v612_v12 = vpop.f32.mrf.mxu0  ;;  %v3223_v2 = vld [vmem:[#allocation5 + $0x1c0] sm:$0xff]  }
 0x1d9   :  { %v722_v13 = vpop.f32.mrf.mxu1 }
 0x1da   :  { %v723_v14 = vadd.f32 %v722_v13, %v646_v8  ;;  %v2968_v15 = vpop.f32.mrf.mxu0  ;;  %v795_v16 = vmax.f32 %v721_v11, 0.0  ;;  %v3226_v8 = vld [vmem:[#allocation5 + $0x200] sm:$0xff]  }
 0x1dc   :  { %v796_v17 = vmax.f32 %v723_v14, 0.0  ;;  %v798_v20 = vpack.c.bf16 %v795_v16, %v795_v16  ;;  %v2623_v16 = vld [vmem:[%s3642_s2 + $0x6] sm:$0x7] }
 0x1de   :  { %v799_v19 = vpack.c.bf16 %v796_v17, %v796_v17 }
 0x1e0   :  { %v791_v52 = vpop.f32.mrf.mxu0  ;;  %1027 = vmatprep.mubr.bf16.mxu1 %v799_v19 }
 0x1e1   :  { %v792_v23 = vadd.f32 %v791_v52, %v650_v18  ;;  %1028 = vmatmul.mubr.bf16.vlgmr.msra.gmra.mxu1 %v798_v20  ;;  %v1102_v20 = vrot.slane %v2623_v16, %v3468_v55  ;;  %v1106_v52 = vrot.slane %v2623_v16, %v3473_v57 }
 0x1e2   :  { %1135 = vmatpush1.msra.mxu1 %v1093_v21  ;;  %v2983_v26 = vpop.f32.mrf.mxu0  ;;  %1178 = vmatprep.mubr.f32.mxu1 %v3353_v0 }
 0x1e3   :  { %v797_v27 = vmax.f32 %v792_v23, 0.0  ;;  %1136 = vmatprep.subr.mxu1 %v1091_v22 }
 0x1e4   :  { %1137 = vmatpush1.msra.mxu1 %v1090_v24 }
 0x1e5   :  { %v800_v30 = vpack.c.bf16 %v797_v27, %v797_v27  ;;  %1138 = vmatprep.subr.mxu1 %v1088_v25  ;;  %v1110_v27 = vrot.slane %v2623_v16, %v3477_v3  ;;  %v3247_v16 = vld [vmem:[#allocation5 + $0x2c8] sm:$0xff]  }
 0x1e6   :  { %1139 = vmatpush1.msra.mxu1 %v1087_v28 }
 0x1e7   :  { %1140 = vmatprep.subr.mxu1 %v1085_v29  ;;  %3001 = vmatmul.mubr.bf16.vlgmr.msra.gmra.mxu0 %v800_v30 }
 0x1e8   :  { %1141 = vmatpush1.msra.mxu1 %v1084_v31  ;;  %3005 = vmatpush3.msra.mxu0 %v1095_v32 }
 0x1e9   :  { %1142 = vmatprep.subr.mxu1 %v1082_v33  ;;  %3006 = vmatprep.subr.mxu0 %v3353_v0 }
 0x1ea   :  { %1143 = vmatpush1.msra.mxu1 %v1081_v34  ;;  %3007 = vmatpush3.msra.mxu0 %v1092_v35 }
 0x1eb   :  { %1144 = vmatprep.subr.mxu1 %v1079_v36  ;;  %3008 = vmatprep.subr.mxu0 %v3353_v0  ;;  %v1551_v36 = vld [vmem:[#allocation3 + $0x230] sm:$0xff] }
 0x1ec   :  { %1145 = vmatpush1.msra.mxu1 %v1078_v37  ;;  %3009 = vmatpush3.msra.mxu0 %v1089_v38  ;;  %v1550_v37 = vld [vmem:[#allocation3 + $0x228] sm:$0xff] }
 0x1ed   :  { %2624 = vmatmul.mubr.msk.f32.vlgmr.msra.gmra.mxu1 %vm85_vm1, %v3521_v7  ;;  %3010 = vmatprep.subr.mxu0 %v3353_v0 }
 0x1ee   :  { %3011 = vmatpush3.msra.mxu0 %v1086_v39  ;;  %3016 = vmatprep.mubr.msk.f32.mxu0 %vm3354_vm0, %v3353_v0  ;;  %v1548_v39 = vld [vmem:[#allocation3 + $0x1b8] sm:$0xff] }
 0x1ef   :  { %3012 = vmatprep.subr.mxu0 %v3353_v0  ;;  %2795 = vmatprep.subr.bf16.mxu1 %v3203_v40  ;;  %v1555_v40 = vld [vmem:[#allocation3 + $0x2b0] sm:$0xff] }
 0x1f0   :  { %3013 = vmatpush3.msra.mxu0 %v1083_v42  ;;  %2796 = vmatpush3.bf16.msra.mxu1 %v3204_v41  ;;  %v1547_v41 = vld [vmem:[#allocation3 + $0x1b0] sm:$0xff]  ;;  %v1545_v42 = vld [vmem:[#allocation3 + $0x140] sm:$0xff] }
 0x1f1   :  { %3014 = vmatprep.subr.mxu0 %v3353_v0  ;;  %2797 = vmatprep.subr.bf16.mxu1 %v3205_v43  ;;  %v1552_v43 = vld [vmem:[#allocation3 + $0x238] sm:$0xff] }
 0x1f2   :  { %3015 = vmatpush3.msra.mxu0 %v1080_v44  ;;  %v1544_v44 = vld [vmem:[#allocation3 + $0x138] sm:$0xff] }
 0x1f3   :  { %3017 = vmatmul.mubr.msk.f32.vlgmr.msra.gmra.mxu0 %vm85_vm1, %v3521_v7  ;;  %3019 = vmatprep.subr.bf16.mxu0 %v3353_v0 }
 0x1f4   :  { %2798 = vmatpush3.bf16.msra.mxu1 %v3206_v45  ;;  %3020 = vmatpush3.bf16.msra.mxu0 %v3207_v46  ;;  %v1542_v45 = vld [vmem:[#allocation3 + $0xc8] sm:$0xff]  ;;  %v1549_v46 = vld [vmem:[#allocation3 + $0x1c0] sm:$0xff] }
 0x1f5   :  { %2799 = vmatprep.subr.bf16.mxu1 %v3208_v47  ;;  %3021 = vmatprep.subr.bf16.mxu0 %v3353_v0  ;;  %v1541_v47 = vld [vmem:[#allocation3 + $0xc0] sm:$0xff] }
 0x1f6   :  { %3035 = vmatprep.mubr.msk.bf16.mxu0 %vm3354_vm0, %v3353_v0 }
 0x1f8   :  { %2800 = vmatpush3.bf16.msra.mxu1 %v3209_v48  ;;  %3022 = vmatpush3.bf16.msra.mxu0 %v3210_v49  ;;  %v1539_v48 = vld [vmem:[#allocation3 + $0x50] sm:$0xff]  ;;  %v1546_v49 = vld [vmem:[#allocation3 + $0x148] sm:$0xff] }
 0x1f9   :  { %3023 = vmatprep.subr.bf16.mxu0 %v3353_v0  ;;  %2801 = vmatprep.subr.bf16.mxu1 %v3211_v50  ;;  %v1538_v50 = vld [vmem:[#allocation3 + $0x48] sm:$0xff] }
 0x1fc   :  { %2802 = vmatpush3.bf16.msra.mxu1 %v3212_v51  ;;  %3024 = vmatpush3.bf16.msra.mxu0 %v3213_v53  ;;  %v1543_v51 = vld [vmem:[#allocation3 + $0xd0] sm:$0xff]  ;;  %v3227_v53 = vld [vmem:[#allocation5 + $0x2b8] sm:$0xff]  }
 0x1fd   :  { %3025 = vmatprep.subr.bf16.mxu0 %v3353_v0  ;;  %2803 = vmatprep.subr.bf16.mxu1 %v3214_v54  ;;  %v1540_v54 = vld [vmem:[#allocation3 + $0x58] sm:$0xff] }
 0x200   :  { %2804 = vmatpush3.bf16.msra.mxu1 %v3215_v56  ;;  %3026 = vmatpush3.bf16.msra.mxu0 %v3216_v58  ;;  %v3228_v56 = vld [vmem:[#allocation5 + $0x278] sm:$0xff]   ;;  %v3230_v58 = vld [vmem:[#allocation5 + $0x2b0] sm:$0xff]  }
 0x201   :  { %3027 = vmatprep.subr.bf16.mxu0 %v3353_v0  ;;  %2805 = vmatprep.subr.bf16.mxu1 %v3217_v59  ;;  %v3229_v59 = vld [vmem:[#allocation5 + $0x2f8] sm:$0xff]  }
 0x204   :  { %2806 = vmatpush3.bf16.msra.mxu1 %v3218_v60  ;;  %3028 = vmatpush3.bf16.msra.mxu0 %v3219_v61  ;;  %v3231_v60 = vld [vmem:[#allocation5 + $0x270] sm:$0xff]   ;;  %v3233_v61 = vld [vmem:[#allocation5 + $0x2a8] sm:$0xff]  }
 0x205   :  { %3029 = vmatprep.subr.bf16.mxu0 %v3353_v0  ;;  %2807 = vmatprep.subr.bf16.mxu1 %v3220_v62  ;;  %v3232_v62 = vld [vmem:[#allocation5 + $0x2f0] sm:$0xff]  }
 0x208   :  { %2808 = vmatpush3.bf16.msra.mxu1 %v3221_v63  ;;  %3030 = vmatpush3.bf16.msra.mxu0 %v3222_v1  ;;  %v3234_v63 = vld [vmem:[#allocation5 + $0x268] sm:$0xff]  }
 0x209   :  { %3031 = vmatprep.subr.bf16.mxu0 %v3353_v0  ;;  %2809 = vmatprep.subr.bf16.mxu1 %v3223_v2  ;;  %v3235_v1 = vld [vmem:[#allocation5 + $0x2e8] sm:$0xff]   ;;  %v3236_v2 = vld [vmem:[#allocation5 + $0x2a0] sm:$0xff]  }
 0x20c   :  { %2810 = vmatpush3.bf16.msra.mxu1 %v3224_v4  ;;  %3032 = vmatpush3.bf16.msra.mxu0 %v3225_v5  ;;  %v3237_v4 = vld [vmem:[#allocation5 + $0x260] sm:$0xff]  }
 0x20d   :  { %3033 = vmatprep.subr.bf16.mxu0 %v3353_v0  ;;  %1594 = vmatprep.subr.mxu1 %v1554_v6  ;;  %v3238_v5 = vld [vmem:[#allocation5 + $0x2e0] sm:$0xff]   ;;  %v3239_v6 = vld [vmem:[#allocation5 + $0x298] sm:$0xff]  }
 0x210   :  { %3034 = vmatpush3.bf16.msra.mxu0 %v3226_v8  ;;  %v3240_v8 = vld [vmem:[#allocation5 + $0x258] sm:$0xff]  }
 0x211   :  { %3039 = vmatprep.subr.mxu0 %v3353_v0 }
 0x2a1   :  { %v2773_v10 = vpop.f32.mrf.mxu1 }
 0x2a3   :  { %v2774_v11 = vpop.f32.mrf.mxu1 }
 0x2a4   :  { %v2775_v12 = vadd.f32 %v2774_v11, %v2773_v10  ;;  %v3241_v10 = vld [vmem:[#allocation5 + $0x2d8] sm:$0xff]   ;;  %v3242_v11 = vld [vmem:[#allocation5 + $0x290] sm:$0xff]  }
 0x2a5   :  { %v2776_v13 = vpop.f32.mrf.mxu1 }
 0x2a6   :  { %v3244_v13 = vld [vmem:[#allocation5 + $0x2d0] sm:$0xff]  }
 0x2a7   :  { %v2777_v14 = vpop.f32.mrf.mxu1  ;;  %v1069_v15 = vpop.f32.mrf.mxu0 }
 0x2a8   :  { %v1070_v17 = vadd.f32 %v2775_v12, %v1069_v15  ;;  %v3243_v12 = vld [vmem:[#allocation5 + $0x250] sm:$0xff]   ;;  %v3245_v14 = vld [vmem:[#allocation5 + $0x288] sm:$0xff]  }
 0x2a9   :  { %v3002_v18 = vpop.f32.mrf.mxu0  ;;  %v3246_v15 = vld [vmem:[#allocation5 + $0x248] sm:$0xff]  }
 0x2aa   :  { %v3547_v19 = vadd.f32 %v1070_v17, %v3512_v9  ;;  %v1553_v9 = vld [vmem:[#allocation3 + $0x2a0] sm:$0xff]  ;;  %v3248_v17 = vld [vmem:[#allocation5 + $0x280] sm:$0xff]  }
 0x2ab   :  { %v1072_v21 = vpop.f32.mrf.mxu0  ;;  %v3249_v18 = vld [vmem:[#allocation5 + $0x240] sm:$0xff]  }
 0x2ac   :  { %v2014_v21 = vld [vmem:[#allocation3 + $0x2c0] sm:$0xff] }
 0x2ad   :  { %v1180_v22 = vpop.f32.mrf.mxu1  ;;  %v3003_v23 = vpop.f32.mrf.mxu0 }
 0x2ae   :  { %v1181_v24 = vadd.f32 %v1180_v22, %v1102_v20  ;;  %v3250_v20 = vld [vmem:[#allocation5 + $0x2c0] sm:$0xff]  }
 0x2af   :  { %v1182_v25 = vpop.f32.mrf.mxu1 }
 0x2b0   :  { %v1183_v26 = vadd.f32 %v1182_v25, %v1106_v52  ;;  %v1255_v28 = vmax.f32 %v1181_v24, 0.0 }
 0x2b2   :  { %v1256_v29 = vmax.f32 %v1183_v26, 0.0  ;;  %v1258_v33 = vpack.c.bf16 %v1255_v28, %v1255_v28 }
 0x2b3   :  { %v1251_v30 = vpop.f32.mrf.mxu0 }
 0x2b4   :  { %v1259_v31 = vpack.c.bf16 %v1256_v29, %v1256_v29  ;;  %v1252_v32 = vadd.f32 %v1251_v30, %v1110_v27  ;;  %v2650_v29 = vld [vmem:[%s3642_s2 + $0x9] sm:$0x7] }
 0x2b5   :  { %v3018_v34 = vpop.f32.mrf.mxu0 }
 0x2b6   :  { %v1257_v35 = vmax.f32 %v1252_v32, 0.0  ;;  %1487 = vmatprep.mubr.bf16.mxu1 %v1259_v31 }
 0x2b7   :  { %1488 = vmatmul.mubr.bf16.vlgmr.msra.gmra.mxu1 %v1258_v33  ;;  %v1562_v33 = vrot.slane %v2650_v29, %v3468_v55 }
 0x2b8   :  { %v1260_v38 = vpack.c.bf16 %v1257_v35, %v1257_v35  ;;  %1595 = vmatpush1.msra.mxu1 %v1553_v9  ;;  %1638 = vmatprep.mubr.f32.mxu1 %v3353_v0  ;;  %v1566_v9 = vrot.slane %v2650_v29, %v3473_v57  ;;  %v1570_v35 = vrot.slane %v2650_v29, %v3477_v3  ;;  %v3274_v29 = vld [vmem:[#allocation5 + $0x300] sm:$0xff]  }
 0x2b9   :  { %1596 = vmatprep.subr.mxu1 %v1551_v36 }
 0x2ba   :  { %1597 = vmatpush1.msra.mxu1 %v1550_v37  ;;  %3036 = vmatmul.mubr.bf16.vlgmr.msra.gmra.mxu0 %v1260_v38 }
 0x2bb   :  { %1598 = vmatprep.subr.mxu1 %v1548_v39  ;;  %3040 = vmatpush3.msra.mxu0 %v1555_v40 }
 0x2bc   :  { %1599 = vmatpush1.msra.mxu1 %v1547_v41  ;;  %3041 = vmatprep.subr.mxu0 %v3353_v0 }
 0x2bd   :  { %1600 = vmatprep.subr.mxu1 %v1545_v42  ;;  %3042 = vmatpush3.msra.mxu0 %v1552_v43 }
 0x2be   :  { %1601 = vmatpush1.msra.mxu1 %v1544_v44  ;;  %3043 = vmatprep.subr.mxu0 %v3353_v0 }
 0x2bf   :  { %1602 = vmatprep.subr.mxu1 %v1542_v45  ;;  %3044 = vmatpush3.msra.mxu0 %v1549_v46 }
 0x2c0   :  { %1603 = vmatpush1.msra.mxu1 %v1541_v47  ;;  %3045 = vmatprep.subr.mxu0 %v3353_v0  ;;  %v2013_v47 = vld [vmem:[#allocation3 + $0x2b8] sm:$0xff] }
 0x2c1   :  { %1604 = vmatprep.subr.mxu1 %v1539_v48  ;;  %3046 = vmatpush3.msra.mxu0 %v1546_v49  ;;  %v2015_v48 = vld [vmem:[#allocation3 + $0x2c8] sm:$0xff] }
 0x2c2   :  { %1605 = vmatpush1.msra.mxu1 %v1538_v50  ;;  %3047 = vmatprep.subr.mxu0 %v3353_v0  ;;  %v2011_v49 = vld [vmem:[#allocation3 + $0x248] sm:$0xff]  ;;  %v2010_v50 = vld [vmem:[#allocation3 + $0x240] sm:$0xff] }
 0x2c3   :  { %2651 = vmatmul.mubr.msk.f32.vlgmr.msra.gmra.mxu1 %vm85_vm1, %v3521_v7  ;;  %3048 = vmatpush3.msra.mxu0 %v1543_v51  ;;  %v2012_v51 = vld [vmem:[#allocation3 + $0x250] sm:$0xff] }
 0x2c4   :  { %3049 = vmatprep.subr.mxu0 %v3353_v0  ;;  %3051 = vmatprep.mubr.msk.f32.mxu0 %vm3354_vm0, %v3353_v0 }
 0x2c5   :  { %3050 = vmatpush3.msra.mxu0 %v1540_v54  ;;  %2833 = vmatprep.subr.bf16.mxu1 %v3227_v53  ;;  %v2008_v53 = vld [vmem:[#allocation3 + $0x1d0] sm:$0xff]  ;;  %v2007_v54 = vld [vmem:[#allocation3 + $0x1c8] sm:$0xff] }
 0x2c6   :  { %3052 = vmatmul.mubr.msk.f32.vlgmr.msra.gmra.mxu0 %vm85_vm1, %v3521_v7  ;;  %2834 = vmatpush3.bf16.msra.mxu1 %v3228_v56  ;;  %v2009_v56 = vld [vmem:[#allocation3 + $0x1d8] sm:$0xff] }
 0x2c7   :  { %3054 = vmatprep.subr.bf16.mxu0 %v3353_v0  ;;  %2835 = vmatprep.subr.bf16.mxu1 %v3230_v58  ;;  %v2005_v58 = vld [vmem:[#allocation3 + $0x158] sm:$0xff] }
 0x2c8   :  { %3055 = vmatpush3.bf16.msra.mxu0 %v3229_v59  ;;  %3070 = vmatprep.mubr.msk.bf16.mxu0 %vm3354_vm0, %v3353_v0  ;;  %v2004_v59 = vld [vmem:[#allocation3 + $0x150] sm:$0xff] }
 0x2c9   :  { %3056 = vmatprep.subr.bf16.mxu0 %v3353_v0 }
 0x2ca   :  { %2836 = vmatpush3.bf16.msra.mxu1 %v3231_v60  ;;  %v2006_v60 = vld [vmem:[#allocation3 + $0x160] sm:$0xff] }
 0x2cb   :  { %2837 = vmatprep.subr.bf16.mxu1 %v3233_v61  ;;  %v2002_v61 = vld [vmem:[#allocation3 + $0xe0] sm:$0xff] }
 0x2cc   :  { %3057 = vmatpush3.bf16.msra.mxu0 %v3232_v62  ;;  %v2001_v62 = vld [vmem:[#allocation3 + $0xd8] sm:$0xff] }
 0x2cd   :  { %3058 = vmatprep.subr.bf16.mxu0 %v3353_v0 }
 0x2ce   :  { %2838 = vmatpush3.bf16.msra.mxu1 %v3234_v63  ;;  %v2003_v63 = vld [vmem:[#allocation3 + $0xe8] sm:$0xff] }
 0x2cf   :  { %2839 = vmatprep.subr.bf16.mxu1 %v3236_v2  ;;  %v1998_v2 = vld [vmem:[#allocation3 + $0x60] sm:$0xff] }
 0x2d0   :  { %3059 = vmatpush3.bf16.msra.mxu0 %v3235_v1  ;;  %v1999_v1 = vld [vmem:[#allocation3 + $0x68] sm:$0xff] }
 0x2d1   :  { %3060 = vmatprep.subr.bf16.mxu0 %v3353_v0 }
 0x2d2   :  { %2840 = vmatpush3.bf16.msra.mxu1 %v3237_v4  ;;  %v2000_v4 = vld [vmem:[#allocation3 + $0x70] sm:$0xff] }
 0x2d3   :  { %2841 = vmatprep.subr.bf16.mxu1 %v3239_v6  ;;  %v3251_v6 = vld [vmem:[#allocation5 + $0x3b8] sm:$0xff]  }
 0x2d4   :  { %3061 = vmatpush3.bf16.msra.mxu0 %v3238_v5  ;;  %v3252_v5 = vld [vmem:[#allocation5 + $0x378] sm:$0xff]  }
 0x2d5   :  { %3062 = vmatprep.subr.bf16.mxu0 %v3353_v0 }
 0x2d6   :  { %2842 = vmatpush3.bf16.msra.mxu1 %v3240_v8  ;;  %v3253_v8 = vld [vmem:[#allocation5 + $0x338] sm:$0xff]  }
 0x2d7   :  { %2843 = vmatprep.subr.bf16.mxu1 %v3242_v11  ;;  %v3254_v11 = vld [vmem:[#allocation5 + $0x3b0] sm:$0xff]  }
 0x2d8   :  { %3063 = vmatpush3.bf16.msra.mxu0 %v3241_v10  ;;  %v3255_v10 = vld [vmem:[#allocation5 + $0x370] sm:$0xff]  }
 0x2d9   :  { %3064 = vmatprep.subr.bf16.mxu0 %v3353_v0 }
 0x2da   :  { %2844 = vmatpush3.bf16.msra.mxu1 %v3243_v12  ;;  %v3256_v12 = vld [vmem:[#allocation5 + $0x330] sm:$0xff]  }
 0x2db   :  { %2845 = vmatprep.subr.bf16.mxu1 %v3245_v14  ;;  %v3257_v14 = vld [vmem:[#allocation5 + $0x3a8] sm:$0xff]  }
 0x2dc   :  { %3065 = vmatpush3.bf16.msra.mxu0 %v3244_v13  ;;  %v3258_v13 = vld [vmem:[#allocation5 + $0x368] sm:$0xff]  }
 0x2dd   :  { %3066 = vmatprep.subr.bf16.mxu0 %v3353_v0 }
 0x2de   :  { %2846 = vmatpush3.bf16.msra.mxu1 %v3246_v15  ;;  %v3259_v15 = vld [vmem:[#allocation5 + $0x328] sm:$0xff]  }
 0x2df   :  { %2847 = vmatprep.subr.bf16.mxu1 %v3248_v17  ;;  %v3262_v17 = vld [vmem:[#allocation5 + $0x320] sm:$0xff]  }
 0x2e0   :  { %3067 = vmatpush3.bf16.msra.mxu0 %v3247_v16  ;;  %v3261_v16 = vld [vmem:[#allocation5 + $0x360] sm:$0xff]  }
 0x2e1   :  { %3068 = vmatprep.subr.bf16.mxu0 %v3353_v0 }
 0x2e2   :  { %2848 = vmatpush3.bf16.msra.mxu1 %v3249_v18  ;;  %v3263_v18 = vld [vmem:[#allocation5 + $0x398] sm:$0xff]  }
 0x2e3   :  { %2054 = vmatprep.subr.mxu1 %v2014_v21  ;;  %v3265_v21 = vld [vmem:[#allocation5 + $0x318] sm:$0xff]  }
 0x2e4   :  { %3069 = vmatpush3.bf16.msra.mxu0 %v3250_v20  ;;  %v3264_v20 = vld [vmem:[#allocation5 + $0x358] sm:$0xff]  }
 0x2e5   :  { %3074 = vmatprep.subr.mxu0 %v3353_v0 }
 0x377   :  { %v2811_v52 = vpop.f32.mrf.mxu1 }
 0x379   :  { %v2812_v22 = vpop.f32.mrf.mxu1 }
 0x37a   :  { %v2813_v23 = vadd.f32 %v2812_v22, %v2811_v52  ;;  %v1529_v24 = vpop.f32.mrf.mxu0  ;;  %v3266_v52 = vld [vmem:[#allocation5 + $0x390] sm:$0xff]  }
 0x37b   :  { %v2814_v25 = vpop.f32.mrf.mxu1  ;;  %v3267_v22 = vld [vmem:[#allocation5 + $0x350] sm:$0xff]  }
 0x37c   :  { %v1530_v26 = vadd.f32 %v2813_v23, %v1529_v24  ;;  %v3037_v27 = vpop.f32.mrf.mxu0  ;;  %v3268_v23 = vld [vmem:[#allocation5 + $0x310] sm:$0xff]   ;;  %v3269_v24 = vld [vmem:[#allocation5 + $0x388] sm:$0xff]  }
 0x37d   :  { %v2815_v28 = vpop.f32.mrf.mxu1  ;;  %v3270_v25 = vld [vmem:[#allocation5 + $0x348] sm:$0xff]   ;;  %v3272_v27 = vld [vmem:[#allocation5 + $0x380] sm:$0xff]  }
 0x37e   :  { %v3579_v30 = vadd.f32 %v1530_v26, %v3547_v19  ;;  %v1532_v31 = vpop.f32.mrf.mxu0  ;;  %v3271_v26 = vld [vmem:[#allocation5 + $0x308] sm:$0xff]   ;;  %v3273_v28 = vld [vmem:[#allocation5 + $0x340] sm:$0xff]  }
 0x380   :  { %v3038_v32 = vpop.f32.mrf.mxu0 }
 0x383   :  { %v1640_v34 = vpop.f32.mrf.mxu1 }
 0x384   :  { %v1641_v36 = vadd.f32 %v1640_v34, %v1562_v33 }
 0x385   :  { %v1642_v37 = vpop.f32.mrf.mxu1 }
 0x386   :  { %v1643_v38 = vadd.f32 %v1642_v37, %v1566_v9  ;;  %v1711_v39 = vpop.f32.mrf.mxu0  ;;  %v1715_v40 = vmax.f32 %v1641_v36, 0.0 }
 0x387   :  { %v1712_v41 = vadd.f32 %v1711_v39, %v1570_v35 }
 0x388   :  { %v1716_v42 = vmax.f32 %v1643_v38, 0.0  ;;  %v3053_v43 = vpop.f32.mrf.mxu0  ;;  %v1718_v45 = vpack.c.bf16 %v1715_v40, %v1715_v40  ;;  %v2677_v40 = vld [vmem:[%s3642_s2 + $0xc] sm:$0x7] }
 0x389   :  { %v1717_v44 = vmax.f32 %v1712_v41, 0.0  ;;  %v2030_v43 = vrot.slane %v2677_v40, %v3477_v3  ;;  %v2471_v3 = vld [vmem:[#allocation7 + $0x60] sm:$0xff] }
 0x38a   :  { %v1719_v19 = vpack.c.bf16 %v1716_v42, %v1716_v42  ;;  %v2022_v42 = vrot.slane %v2677_v40, %v3468_v55  ;;  %v2473_v55 = vld [vmem:[#allocation7 + $0x70] sm:$0xff] }
 0x38b   :  { %v1720_v46 = vpack.c.bf16 %v1717_v44, %v1717_v44  ;;  %v2026_v44 = vrot.slane %v2677_v40, %v3473_v57  ;;  %v2472_v57 = vld [vmem:[#allocation7 + $0x68] sm:$0xff] }
 0x38c   :  { %1947 = vmatprep.mubr.bf16.mxu1 %v1719_v19 }
 0x38d   :  { %1948 = vmatmul.mubr.bf16.vlgmr.msra.gmra.mxu1 %v1718_v45  ;;  %3071 = vmatmul.mubr.bf16.vlgmr.msra.gmra.mxu0 %v1720_v46 }
 0x38e   :  { %2055 = vmatpush1.msra.mxu1 %v2013_v47  ;;  %3075 = vmatpush3.msra.mxu0 %v2015_v48 }
 0x38f   :  { %2056 = vmatprep.subr.mxu1 %v2011_v49  ;;  %3076 = vmatprep.subr.mxu0 %v3353_v0 }
 0x390   :  { %2057 = vmatpush1.msra.mxu1 %v2010_v50  ;;  %3077 = vmatpush3.msra.mxu0 %v2012_v51 }
 0x391   :  { %2058 = vmatprep.subr.mxu1 %v2008_v53  ;;  %3078 = vmatprep.subr.mxu0 %v3353_v0 }
 0x392   :  { %2059 = vmatpush1.msra.mxu1 %v2007_v54  ;;  %3079 = vmatpush3.msra.mxu0 %v2009_v56 }
 0x393   :  { %2060 = vmatprep.subr.mxu1 %v2005_v58  ;;  %3080 = vmatprep.subr.mxu0 %v3353_v0 }
 0x394   :  { %2061 = vmatpush1.msra.mxu1 %v2004_v59  ;;  %3081 = vmatpush3.msra.mxu0 %v2006_v60  ;;  %v2474_v59 = vld [vmem:[#allocation7 + $0x78] sm:$0xff] }
 0x395   :  { %2062 = vmatprep.subr.mxu1 %v2002_v61  ;;  %3082 = vmatprep.subr.mxu0 %v3353_v0  ;;  %v2470_v60 = vld [vmem:[#allocation7 + $0x58] sm:$0xff]  ;;  %v2469_v61 = vld [vmem:[#allocation7 + $0x50] sm:$0xff] }
 0x396   :  { %2063 = vmatpush1.msra.mxu1 %v2001_v62  ;;  %3083 = vmatpush3.msra.mxu0 %v2003_v63  ;;  %v2468_v62 = vld [vmem:[#allocation7 + $0x48] sm:$0xff]  ;;  %v2467_v63 = vld [vmem:[#allocation7 + $0x40] sm:$0xff] }
 0x397   :  { %2064 = vmatprep.subr.mxu1 %v1999_v1  ;;  %2098 = vmatprep.mubr.f32.mxu1 %v3353_v0  ;;  %v2466_v1 = vld [vmem:[#allocation7 + $0x38] sm:$0xff] }
 0x398   :  { %2065 = vmatpush1.msra.mxu1 %v1998_v2  ;;  %3084 = vmatprep.subr.mxu0 %v3353_v0  ;;  %v2465_v2 = vld [vmem:[#allocation7 + $0x30] sm:$0xff] }
 0x399   :  { %2678 = vmatmul.mubr.msk.f32.vlgmr.msra.gmra.mxu1 %vm85_vm1, %v3521_v7  ;;  %3085 = vmatpush3.msra.mxu0 %v2000_v4  ;;  %v2464_v4 = vld [vmem:[#allocation7 + $0x28] sm:$0xff] }
 0x39a   :  { %3086 = vmatprep.mubr.msk.f32.mxu0 %vm3354_vm0, %v3353_v0  ;;  %3089 = vmatprep.subr.bf16.mxu0 %v3353_v0 }
 0x39b   :  { %3087 = vmatmul.mubr.msk.f32.vlgmr.msra.gmra.mxu0 %vm85_vm1, %v3521_v7  ;;  %2871 = vmatprep.subr.bf16.mxu1 %v3252_v5  ;;  %v3260_v7 = vld [vmem:[#allocation5 + $0x3a0] sm:$0xff]  }
 0x39c   :  { %3090 = vmatpush3.bf16.msra.mxu0 %v3251_v6  ;;  %2872 = vmatpush3.bf16.msra.mxu1 %v3253_v8  ;;  %v2463_v5 = vld [vmem:[#allocation7 + $0x20] sm:$0xff]  ;;  %v2462_v6 = vld [vmem:[#allocation7 + $0x18] sm:$0xff]  ;;  %v2461_v8 = vld [vmem:[#allocation7 + $0x10] sm:$0xff] }
 0x39d   :  { %3091 = vmatprep.subr.bf16.mxu0 %v3353_v0  ;;  %2873 = vmatprep.subr.bf16.mxu1 %v3255_v10  ;;  %v2460_v10 = vld [vmem:[#allocation7 + $0x8] sm:$0xff] }
 0x39e   :  { %3105 = vmatprep.mubr.msk.bf16.mxu0 %vm3354_vm0, %v3353_v0 }
 0x3a0   :  { %3092 = vmatpush3.bf16.msra.mxu0 %v3254_v11  ;;  %2874 = vmatpush3.bf16.msra.mxu1 %v3256_v12  ;;  %v2459_v11 = vld [vmem:[#allocation7] sm:$0xff] }
 0x3a1   :  { %3093 = vmatprep.subr.bf16.mxu0 %v3353_v0  ;;  %2875 = vmatprep.subr.bf16.mxu1 %v3258_v13 }
 0x3a4   :  { %3094 = vmatpush3.bf16.msra.mxu0 %v3257_v14  ;;  %2876 = vmatpush3.bf16.msra.mxu1 %v3259_v15 }
 0x3a5   :  { %3095 = vmatprep.subr.bf16.mxu0 %v3353_v0  ;;  %2877 = vmatprep.subr.bf16.mxu1 %v3261_v16 }
 0x3a8   :  { %3096 = vmatpush3.bf16.msra.mxu0 %v3260_v7  ;;  %2878 = vmatpush3.bf16.msra.mxu1 %v3262_v17 }
 0x3a9   :  { %3097 = vmatprep.subr.bf16.mxu0 %v3353_v0  ;;  %2879 = vmatprep.subr.bf16.mxu1 %v3264_v20 }
 0x3ac   :  { %3098 = vmatpush3.bf16.msra.mxu0 %v3263_v18  ;;  %2880 = vmatpush3.bf16.msra.mxu1 %v3265_v21 }
 0x3ad   :  { %3099 = vmatprep.subr.bf16.mxu0 %v3353_v0  ;;  %2881 = vmatprep.subr.bf16.mxu1 %v3267_v22 }
 0x3b0   :  { %3100 = vmatpush3.bf16.msra.mxu0 %v3266_v52  ;;  %2882 = vmatpush3.bf16.msra.mxu1 %v3268_v23  ;;  %v2704_v23 = vld [vmem:[%s3647_s7] ss:$0 sm:$0xff] }
 0x3b1   :  { %3101 = vmatprep.subr.bf16.mxu0 %v3353_v0  ;;  %2883 = vmatprep.subr.bf16.mxu1 %v3270_v25 }
 0x3b4   :  { %3102 = vmatpush3.bf16.msra.mxu0 %v3269_v24  ;;  %2884 = vmatpush3.bf16.msra.mxu1 %v3271_v26 }
 0x3b5   :  { %3103 = vmatprep.subr.bf16.mxu0 %v3353_v0  ;;  %2885 = vmatprep.subr.bf16.mxu1 %v3273_v28 }
 0x3b8   :  { %3104 = vmatpush3.bf16.msra.mxu0 %v3272_v27  ;;  %2886 = vmatpush3.bf16.msra.mxu1 %v3274_v29 }
 0x3b9   :  { %3109 = vmatprep.subr.mxu1 %v3353_v0 }
 0x44d   :  { %v2849_v31 = vpop.f32.mrf.mxu1  ;;  %v1989_v32 = vpop.f32.mrf.mxu0 }
 0x44f   :  { %v2850_v33 = vpop.f32.mrf.mxu1  ;;  %v3072_v9 = vpop.f32.mrf.mxu0 }
 0x450   :  { %v2851_v34 = vadd.f32 %v2850_v33, %v2849_v31 }
 0x451   :  { %v2852_v35 = vpop.f32.mrf.mxu1  ;;  %v1992_v36 = vpop.f32.mrf.mxu0 }
 0x452   :  { %v1990_v37 = vadd.f32 %v2851_v34, %v1989_v32 }
 0x453   :  { %v2853_v38 = vpop.f32.mrf.mxu1  ;;  %v3073_v39 = vpop.f32.mrf.mxu0 }
 0x454   :  { %v3611_v41 = vadd.f32 %v1990_v37, %v3579_v30 }
 0x459   :  { %v2100_v19 = vpop.f32.mrf.mxu1 }
 0x45a   :  { %v2101_v45 = vadd.f32 %v2100_v19, %v2022_v42 }
 0x45b   :  { %v2171_v46 = vpop.f32.mrf.mxu0  ;;  %v2102_v47 = vpop.f32.mrf.mxu1 }
 0x45c   :  { %v2172_v48 = vadd.f32 %v2171_v46, %v2030_v43  ;;  %v2103_v49 = vadd.f32 %v2102_v47, %v2026_v44  ;;  %v2175_v50 = vmax.f32 %v2101_v45, 0.0 }
 0x45d   :  { %v3088_v51 = vpop.f32.mrf.mxu0 }
 0x45e   :  { %v2177_v53 = vmax.f32 %v2172_v48, 0.0  ;;  %v2176_v54 = vmax.f32 %v2103_v49, 0.0  ;;  %v2178_v30 = vpack.c.bf16 %v2175_v50, %v2175_v50 }
 0x460   :  { %v2180_v56 = vpack.c.bf16 %v2177_v53, %v2177_v53  ;;  %v2179_v58 = vpack.c.bf16 %v2176_v54, %v2176_v54 }
 0x462   :  { %3106 = vmatmul.mubr.bf16.vlgmr.msra.gmra.mxu0 %v2180_v56  ;;  %2407 = vmatprep.mubr.bf16.mxu1 %v2179_v58 }
 0x463   :  { %2408 = vmatmul.mubr.bf16.vlgmr.msra.gmra.mxu1 %v2178_v30 }
 0x464   :  { %3110 = vmatpush3.msra.mxu1 %v2474_v59  ;;  %3141 = vmatprep.mubr.msk.f32.mxu1 %vm3354_vm0, %v3353_v0 }
 0x465   :  { %3111 = vmatprep.subr.mxu1 %v3353_v0 }
 0x466   :  { %3112 = vmatpush3.msra.mxu1 %v2473_v55 }
 0x467   :  { %3113 = vmatprep.subr.mxu1 %v3353_v0 }
 0x468   :  { %3114 = vmatpush3.msra.mxu1 %v2472_v57 }
 0x469   :  { %3115 = vmatprep.subr.mxu1 %v3353_v0 }
 0x46a   :  { %3116 = vmatpush3.msra.mxu1 %v2471_v3 }
 0x46b   :  { %3117 = vmatprep.subr.mxu1 %v3353_v0 }
 0x46c   :  { %3118 = vmatpush3.msra.mxu1 %v2470_v60 }
 0x46d   :  { %3119 = vmatprep.subr.mxu1 %v3353_v0 }
 0x46e   :  { %3120 = vmatpush3.msra.mxu1 %v2469_v61 }
 0x46f   :  { %3121 = vmatprep.subr.mxu1 %v3353_v0 }
 0x470   :  { %3122 = vmatpush3.msra.mxu1 %v2468_v62 }
 0x471   :  { %3123 = vmatprep.subr.mxu1 %v3353_v0 }
 0x472   :  { %3124 = vmatpush3.msra.mxu1 %v2467_v63 }
 0x473   :  { %3125 = vmatprep.subr.mxu1 %v3353_v0 }
 0x474   :  { %3126 = vmatpush3.msra.mxu1 %v2466_v1 }
 0x475   :  { %3127 = vmatprep.subr.mxu1 %v3353_v0 }
 0x476   :  { %3128 = vmatpush3.msra.mxu1 %v2465_v2 }
 0x477   :  { %3129 = vmatprep.subr.mxu1 %v3353_v0 }
 0x478   :  { %3130 = vmatpush3.msra.mxu1 %v2464_v4 }
 0x479   :  { %3131 = vmatprep.subr.mxu1 %v3353_v0 }
 0x47a   :  { %3132 = vmatpush3.msra.mxu1 %v2463_v5 }
 0x47b   :  { %3133 = vmatprep.subr.mxu1 %v3353_v0 }
 0x47c   :  { %3134 = vmatpush3.msra.mxu1 %v2462_v6 }
 0x47d   :  { %3135 = vmatprep.subr.mxu1 %v3353_v0 }
 0x47e   :  { %3136 = vmatpush3.msra.mxu1 %v2461_v8 }
 0x47f   :  { %3137 = vmatprep.subr.mxu1 %v3353_v0 }
 0x480   :  { %3138 = vmatpush3.msra.mxu1 %v2460_v10 }
 0x481   :  { %3139 = vmatprep.subr.mxu1 %v3353_v0 }
 0x482   :  { %3140 = vmatpush3.msra.mxu1 %v2459_v11 }
 0x522   :  { %v2449_v12 = vpop.f32.mrf.mxu0 }
 0x523   :  { %v2887_v13 = vpop.f32.mrf.mxu1 }
 0x524   :  { %v3107_v14 = vpop.f32.mrf.mxu0 }
 0x525   :  { %v2888_v15 = vpop.f32.mrf.mxu1 }
 0x526   :  { %v2889_v7 = vadd.f32 %v2888_v15, %v2887_v13  ;;  %v2452_v16 = vpop.f32.mrf.mxu0 }
 0x527   :  { %v2890_v17 = vpop.f32.mrf.mxu1 }
 0x528   :  { %v2450_v18 = vadd.f32 %v2889_v7, %v2449_v12  ;;  %v3108_v20 = vpop.f32.mrf.mxu0 }
 0x529   :  { %v2891_v21 = vpop.f32.mrf.mxu1 }
 0x52a   :  { %v2455_v52 = vadd.f32 %v2450_v18, %v3611_v41 }
 0x52c   :  { %v2458_v22 = vmax.f32 %v2455_v52, 0.0 }
 0x52e   :  { %3142 = vmatmul.mubr.f32.vlgmr.msra.gmra.mxu1 %v2458_v22 }
 0x5ee   :  { %v2548_v0 = vpop.f32.mrf.mxu1 }
 0x5ef   :  { %v2549_v24 = vadd.f32 %v2704_v23, %v2548_v0 }
 0x5f0   :  { %v3143_v25 = vpop.f32.mrf.mxu1 }
 0x5f1   :  { %2552 = vmax.xlane.f32.xlu0 %v2549_v24 }
 0x67a   :  { %v2553_v26 = vpop.xlane.xlu0 %2552 }
 0x67b   :  { %v2554_v27 = vsub.f32 %v2549_v24, %v2553_v26 }
 0x67d   :  { %v2555_v28 = vmul.f32 1.442695, %v2554_v27 }
 0x67f   :  { %3275 = vpow2.f32 %v2555_v28 }
 0x68c   :  { %v3276_v29 = vpop.eup %3275 }
 0x68d   :  { %2557 = vadd.xlane.f32.xlu0 %v3276_v29 }
 0x716   :  { %v2558_v31 = vpop.xlane.xlu0 %2557 }
 0x717   :  { %3277 = vrcp.f32 %v2558_v31 }
 0x724   :  { %v3278_v32 = vpop.eup %3277 }
 0x725   :  { %v2560_v33 = vmul.f32 %v3278_v32, %v3276_v29 }
 0x727   :  { %2561 = vst [vmem:[%s3648_s8] sm:$0xff] %v2560_v33 }
 0x728   :  { %2566 = vsyncpa [#allocation4], 1 }
 0x729   :  { %2567 = vsyncpa [#allocation6], 1 }

</bundles_post_ra>
